<compile_context>
chip_gen: v5e
topology: v5e:2x2
jax: 0.10.0
libtpu: 0.0.40
codegen_flags: <defaults>
</compile_context>

<pallas_src>
import functools
import math

import jax
import jax.numpy as jnp
from jax import lax
from jax.experimental import pallas as pl
from jax.experimental.pallas import tpu as pltpu

EPS = 1e-6
MATMUL_DTYPE = jnp.bfloat16          # MXU operand dtype (accumulation stays f32)
VMEM_LIMIT = 32 * 1024 * 1024        # explicit budget; fits v7x's 64 MiB physical VMEM


def _compiler_params(semantics):
    return pltpu.CompilerParams(dimension_semantics=semantics,
                                vmem_limit_bytes=VMEM_LIMIT)


def _layernorm(x, g, b):
    d = x.shape[-1]
    mean = jnp.mean(x, axis=-1, keepdims=True)
    diff = x - mean
    var = jnp.sum(diff * diff, axis=-1, keepdims=True) / (d - 1)   # unbiased, like torch.std
    std = jnp.sqrt(var)
    return g * diff / (std + EPS) + b


# ------------------------ LocalRNN (windowed tanh RNN) -------------------------
def local_rnn_kernel(x_ref, g_ref, b_ref, wih_ref, whh_ref, bias_ref, o_ref, *, ksize):
    # One batch element per grid step: x_ref is (L, D).  LN is fused here.
    x = x_ref[...]
    seqlen, d = x.shape
    xn = _layernorm(x, g_ref[...], b_ref[...])
    bias = bias_ref[...]                                   # (1, D) = b_ih + b_hh
    # Hoisted input projection: one big matmul instead of ksize small ones.
    pre = jnp.dot(xn.astype(MATMUL_DTYPE), wih_ref[...],
                  preferred_element_type=jnp.float32) + bias           # (L, D)
    if ksize > 1:
        pad = jnp.broadcast_to(bias, (ksize - 1, d))       # zero-padded inputs -> just bias

    def step_input(s):
        # Recurrence step s for output position t consumes projected row
        # t - (ksize-1-s); rows left of the sequence are get_K's zero padding,
        # i.e. exactly `bias` after the projection.
        shift = ksize - 1 - s
        if shift == 0:
            return pre
        return jnp.concatenate([pad[:shift], pre[:seqlen - shift]], axis=0)

    h = jnp.tanh(step_input(0))                            # h_{-1} = 0 -> skip 0 @ W_hh
    for s in range(1, ksize):                              # only h @ W_hh is serialized
        h = jnp.tanh(step_input(s) +
                     jnp.dot(h.astype(MATMUL_DTYPE), whh_ref[...],
                             preferred_element_type=jnp.float32))
    o_ref[...] = x + h                                     # SublayerConnection residual


def local_rnn_layer(x, p, ksize):
    n, l, d = x.shape
    return pl.pallas_call(
        functools.partial(local_rnn_kernel, ksize=ksize),
        out_shape=jax.ShapeDtypeStruct((n, l, d), x.dtype),
        grid=(n,),
        in_specs=[
            pl.BlockSpec((None, l, d), lambda b: (b, 0, 0)),   # activations (per batch)
            pl.BlockSpec((1, d), lambda b: (0, 0)),            # LN gamma (resident)
            pl.BlockSpec((1, d), lambda b: (0, 0)),            # LN beta
            pl.BlockSpec((d, d), lambda b: (0, 0)),            # W_ih^T (bf16, resident)
            pl.BlockSpec((d, d), lambda b: (0, 0)),            # W_hh^T (bf16, resident)
            pl.BlockSpec((1, d), lambda b: (0, 0)),            # b_ih + b_hh
        ],
        out_specs=pl.BlockSpec((None, l, d), lambda b: (b, 0, 0)),
        input_output_aliases={0: 0},                           # update activations in place
        compiler_params=_compiler_params(("parallel",)),
    )(x, p["ln_g"], p["ln_b"], p["w_ih_t"], p["w_hh_t"], p["b_rnn"])


# ------------------------------ MHPooling kernel -------------------------------
def mha_kernel(x_ref, g_ref, b_ref, wq_ref, bq_ref, wk_ref, bk_ref,
               wv_ref, bv_ref, wo_ref, bo_ref, o_ref):
    # grid = (batch, head); the output block (aliased with x) stays resident and
    # accumulates per-head contributions across the "arbitrary" head axis.
    head = pl.program_id(1)
    x = x_ref[...]                                         # (L, D)
    seqlen = x.shape[0]
    dk = wq_ref.shape[-1]
    xn = _layernorm(x, g_ref[...], b_ref[...]).astype(MATMUL_DTYPE)

    q = jnp.dot(xn, wq_ref[...], preferred_element_type=jnp.float32) + bq_ref[...]
    k = jnp.dot(xn, wk_ref[...], preferred_element_type=jnp.float32) + bk_ref[...]
    v = jnp.dot(xn, wv_ref[...], preferred_element_type=jnp.float32) + bv_ref[...]

    qi = lax.broadcasted_iota(jnp.int32, (seqlen, seqlen), 0)
    kj = lax.broadcasted_iota(jnp.int32, (seqlen, seqlen), 1)
    causal_bias = jnp.where(kj <= qi, 0.0, -1e9).astype(jnp.float32)

    scores = lax.dot_general(q.astype(MATMUL_DTYPE), k.astype(MATMUL_DTYPE),
                             (((1,), (1,)), ((), ())),
                             preferred_element_type=jnp.float32)
    scores = scores * (1.0 / math.sqrt(dk)) + causal_bias
    m = jnp.max(scores, axis=-1, keepdims=True)
    e = jnp.exp(scores - m)
    probs = e * pl.reciprocal(jnp.sum(e, axis=-1, keepdims=True), approx=True)
    ctx = jnp.dot(probs.astype(MATMUL_DTYPE), v.astype(MATMUL_DTYPE),
                  preferred_element_type=jnp.float32)                  # (L, dk)
    contrib = jnp.dot(ctx.astype(MATMUL_DTYPE), wo_ref[...],
                      preferred_element_type=jnp.float32)              # (L, D)

    @pl.when(head == 0)
    def _():
        o_ref[...] = x + bo_ref[...]                       # residual + output bias, once
    o_ref[...] += contrib                                  # per-head accumulation


def mha_layer(x, p, nheads):
    n, l, d = x.shape
    dk = d // nheads
    return pl.pallas_call(
        mha_kernel,
        out_shape=jax.ShapeDtypeStruct((n, l, d), x.dtype),
        grid=(n, nheads),
        in_specs=[
            pl.BlockSpec((None, l, d), lambda b, h: (b, 0, 0)),
            pl.BlockSpec((1, d), lambda b, h: (0, 0)),
            pl.BlockSpec((1, d), lambda b, h: (0, 0)),
            pl.BlockSpec((None, d, dk), lambda b, h: (h, 0, 0)),   # Wq (per head)
            pl.BlockSpec((None, 1, dk), lambda b, h: (h, 0, 0)),   # bq
            pl.BlockSpec((None, d, dk), lambda b, h: (h, 0, 0)),   # Wk
            pl.BlockSpec((None, 1, dk), lambda b, h: (h, 0, 0)),   # bk
            pl.BlockSpec((None, d, dk), lambda b, h: (h, 0, 0)),   # Wv
            pl.BlockSpec((None, 1, dk), lambda b, h: (h, 0, 0)),   # bv
            pl.BlockSpec((None, dk, d), lambda b, h: (h, 0, 0)),   # Wo (per head)
            pl.BlockSpec((1, d), lambda b, h: (0, 0)),             # bo
        ],
        out_specs=pl.BlockSpec((None, l, d), lambda b, h: (b, 0, 0)),
        input_output_aliases={0: 0},
        compiler_params=_compiler_params(("parallel", "arbitrary")),
    )(x, p["ln_g"], p["ln_b"], p["wq_r"], p["bq_r"], p["wk_r"], p["bk_r"],
      p["wv_r"], p["bv_r"], p["wo_r"], p["bo"])


# --------------------------------- FFN kernel ----------------------------------
def ffn_kernel(x_ref, g_ref, b_ref, w1_ref, b1_ref, w2_ref, b2_ref, o_ref):
    x = x_ref[...]                                         # (row_tile, D)
    xn = _layernorm(x, g_ref[...], b_ref[...])
    hdn = jnp.dot(xn.astype(MATMUL_DTYPE), w1_ref[...],
                  preferred_element_type=jnp.float32) + b1_ref[...]
    hdn = jnp.maximum(hdn, 0.0)
    out = jnp.dot(hdn.astype(MATMUL_DTYPE), w2_ref[...],
                  preferred_element_type=jnp.float32) + b2_ref[...]
    o_ref[...] = x + out                                   # residual


def _row_tile(m):
    # Largest sublane-aligned row tile that still leaves >= 2 grid steps (so the
    # pipeline actually double-buffers); fall back to the whole extent.
    for c in (512, 256, 128, 64, 32, 16, 8):
        if m % c == 0 and m // c >= 2:
            return c
    for c in (512, 256, 128, 64, 32, 16, 8):
        if m % c == 0:
            return c
    return m


def ffn_layer(x, p):
    n, l, d = x.shape
    m = n * l
    d_ff = p["w1_t"].shape[-1]
    tm = _row_tile(m)
    xf = x.reshape(m, d)
    # TODO(synk): for d_model >= ~1024 in f32 the resident w1/w2 + hidden tile can
    #             exceed v7x's 64 MiB VMEM; tile the d_ff reduction in that regime.
    out = pl.pallas_call(
        ffn_kernel,
        out_shape=jax.ShapeDtypeStruct((m, d), x.dtype),
        grid=(m // tm,),
        in_specs=[
            pl.BlockSpec((tm, d), lambda i: (i, 0)),           # activation row tile
            pl.BlockSpec((1, d), lambda i: (0, 0)),
            pl.BlockSpec((1, d), lambda i: (0, 0)),
            pl.BlockSpec((d, d_ff), lambda i: (0, 0)),          # W1 (bf16, resident)
            pl.BlockSpec((1, d_ff), lambda i: (0, 0)),
            pl.BlockSpec((d_ff, d), lambda i: (0, 0)),          # W2 (bf16, resident)
            pl.BlockSpec((1, d), lambda i: (0, 0)),
        ],
        out_specs=pl.BlockSpec((tm, d), lambda i: (i, 0)),
        input_output_aliases={0: 0},
        compiler_params=_compiler_params(("parallel",)),
    )(xf, p["ln_g"], p["ln_b"], p["w1_t"], p["b1"], p["w2_t"], p["b2"])
    return out.reshape(n, l, d)


# ------------------------------- Block forward ---------------------------------
def block_forward(x, params, *, ksize, nheads):
    for p in params["rnn_layers"]:
        x = local_rnn_layer(x, p, ksize)
    x = mha_layer(x, params["attn"], nheads)
    x = ffn_layer(x, params["ffn"])
    return x


# --------------------------- deterministic param init --------------------------
def init_params(key, d, nheads, nlayers):
    d_ff = 4 * d
    dk = d // nheads
    keys = jax.random.split(key, nlayers + 2)

    def dense(k, din, dout):
        kw, kb = jax.random.split(k)
        bound = 1.0 / math.sqrt(din)
        w = jax.random.uniform(kw, (dout, din), jnp.float32, -bound, bound)
        b = jax.random.uniform(kb, (dout,), jnp.float32, -bound, bound)
        return w.T, b                      # pre-transposed: y = x @ w_t + b

    ln_g = jnp.ones((1, d), jnp.float32)
    ln_b = jnp.zeros((1, d), jnp.float32)

    rnn_layers = []
    for i in range(nlayers):
        k1, k2 = jax.random.split(keys[i])
        w_ih_t, b_ih = dense(k1, d, d)
        w_hh_t, b_hh = dense(k2, d, d)
        rnn_layers.append(dict(
            ln_g=ln_g, ln_b=ln_b,
            w_ih_t=w_ih_t.astype(MATMUL_DTYPE),
            w_hh_t=w_hh_t.astype(MATMUL_DTYPE),
            b_rnn=(b_ih + b_hh).reshape(1, d)))

    kq, kk, kv, ko = jax.random.split(keys[nlayers], 4)
    wq_t, bq = dense(kq, d, d)
    wk_t, bk = dense(kk, d, d)
    wv_t, bv = dense(kv, d, d)
    wo_t, bo = dense(ko, d, d)

    def head_split(w_t, b):                # (D,D)->(H,D,dk) ; (D,)->(H,1,dk)
        w_r = w_t.reshape(d, nheads, dk).transpose(1, 0, 2).astype(MATMUL_DTYPE)
        return w_r, b.reshape(nheads, 1, dk)

    wq_r, bq_r = head_split(wq_t, bq)
    wk_r, bk_r = head_split(wk_t, bk)
    wv_r, bv_r = head_split(wv_t, bv)
    attn = dict(ln_g=ln_g, ln_b=ln_b,
                wq_r=wq_r, bq_r=bq_r, wk_r=wk_r, bk_r=bk_r, wv_r=wv_r, bv_r=bv_r,
                wo_r=wo_t.reshape(nheads, dk, d).astype(MATMUL_DTYPE),
                bo=bo.reshape(1, d))

    k1, k2 = jax.random.split(keys[nlayers + 1])
    w1_t, b1 = dense(k1, d, d_ff)
    w2_t, b2 = dense(k2, d_ff, d)
    ffn = dict(ln_g=ln_g, ln_b=ln_b,
               w1_t=w1_t.astype(MATMUL_DTYPE), b1=b1.reshape(1, d_ff),
               w2_t=w2_t.astype(MATMUL_DTYPE), b2=b2.reshape(1, d))

    return dict(rnn_layers=rnn_layers, attn=attn, ffn=ffn)


if __name__ == "__main__":
    batch, seq, d_model, nheads, ksize, N = 2, 8, 32, 4, 3, 2
    key = jax.random.PRNGKey(0)
    kx, kp = jax.random.split(key)
    x = jax.random.normal(kx, (batch, seq, d_model), jnp.float32)
    params = init_params(kp, d_model, nheads, N)

    fwd = jax.jit(functools.partial(block_forward, ksize=ksize, nheads=nheads))
    out = fwd(x, params)
    jax.block_until_ready(out)
    assert out.shape == (batch, seq, d_model)
    assert bool(jnp.all(jnp.isfinite(out)))
    print("KERNEL_OK")
</pallas_src>

<mosaic_0001>
module attributes {stable_mosaic.version = 11 : i64} {
  func.func @local_rnn_kernel(%arg0: i32, %arg1: memref<1x8x32xf32, #tpu.memory_space<vmem>>, %arg2: memref<1x32xf32, #tpu.memory_space<vmem>>, %arg3: memref<1x32xf32, #tpu.memory_space<vmem>>, %arg4: memref<32x32xbf16, #tpu.memory_space<vmem>>, %arg5: memref<32x32xbf16, #tpu.memory_space<vmem>>, %arg6: memref<1x32xf32, #tpu.memory_space<vmem>>, %arg7: memref<1x8x32xf32, #tpu.memory_space<vmem>>) attributes {dimension_semantics = [#tpu.dimension_semantics<parallel>], iteration_bounds = array<i64: 2>, scalar_prefetch = 0 : i64, scratch_operands = 0 : i64, tpu.core_type = #tpu.core_type<tc>, window_params = [{transform_indices = @transform_0, window_bounds = array<i64: 1, 8, 32>}, {pipeline_mode = #tpu.pipeline_mode<synchronous>, transform_indices = @transform_1, window_bounds = array<i64: 1, 32>}, {pipeline_mode = #tpu.pipeline_mode<synchronous>, transform_indices = @transform_2, window_bounds = array<i64: 1, 32>}, {pipeline_mode = #tpu.pipeline_mode<synchronous>, transform_indices = @transform_3, window_bounds = array<i64: 32, 32>}, {pipeline_mode = #tpu.pipeline_mode<synchronous>, transform_indices = @transform_4, window_bounds = array<i64: 32, 32>}, {pipeline_mode = #tpu.pipeline_mode<synchronous>, transform_indices = @transform_5, window_bounds = array<i64: 1, 32>}, {transform_indices = @transform_6, window_bounds = array<i64: 1, 8, 32>}]} {
    %c0 = arith.constant 0 : index
    %c0_0 = arith.constant 0 : index
    %c0_1 = arith.constant 0 : index
    %0 = vector.load %arg1[%c0, %c0_0, %c0_1] : memref<1x8x32xf32, #tpu.memory_space<vmem>>, vector<1x8x32xf32>
    %1 = vector.shape_cast %0 : vector<1x8x32xf32> to vector<8x32xf32>
    %c0_2 = arith.constant 0 : index
    %c0_3 = arith.constant 0 : index
    %2 = vector.load %arg2[%c0_2, %c0_3] : memref<1x32xf32, #tpu.memory_space<vmem>>, vector<1x32xf32>
    %c0_4 = arith.constant 0 : index
    %c0_5 = arith.constant 0 : index
    %3 = vector.load %arg3[%c0_4, %c0_5] : memref<1x32xf32, #tpu.memory_space<vmem>>, vector<1x32xf32>
    %cst = arith.constant dense<0.000000e+00> : vector<8xf32>
    %4 = vector.multi_reduction <add>, %1, %cst [1] : vector<8x32xf32> to vector<8xf32>
    %5 = vector.shape_cast %4 : vector<8xf32> to vector<8x1xf32>
    %cst_6 = arith.constant 3.200000e+01 : f32
    %6 = vector.broadcast %cst_6 : f32 to vector<8x1xf32>
    %7 = arith.divf %5, %6 : vector<8x1xf32>
    %8 = vector.broadcast %7 : vector<8x1xf32> to vector<8x32xf32>
    %9 = arith.subf %1, %8 : vector<8x32xf32>
    %10 = arith.mulf %9, %9 : vector<8x32xf32>
    %cst_7 = arith.constant dense<0.000000e+00> : vector<8xf32>
    %11 = vector.multi_reduction <add>, %10, %cst_7 [1] : vector<8x32xf32> to vector<8xf32>
    %12 = vector.shape_cast %11 : vector<8xf32> to vector<8x1xf32>
    %cst_8 = arith.constant 3.100000e+01 : f32
    %13 = vector.broadcast %cst_8 : f32 to vector<8x1xf32>
    %14 = arith.divf %12, %13 : vector<8x1xf32>
    %15 = math.sqrt %14 : vector<8x1xf32>
    %16 = vector.broadcast %2 : vector<1x32xf32> to vector<8x32xf32>
    %17 = arith.mulf %16, %9 : vector<8x32xf32>
    %cst_9 = arith.constant 9.99999997E-7 : f32
    %18 = vector.broadcast %cst_9 : f32 to vector<8x1xf32>
    %19 = arith.addf %15, %18 : vector<8x1xf32>
    %20 = vector.broadcast %19 : vector<8x1xf32> to vector<8x32xf32>
    %21 = arith.divf %17, %20 : vector<8x32xf32>
    %22 = vector.broadcast %3 : vector<1x32xf32> to vector<8x32xf32>
    %23 = arith.addf %21, %22 : vector<8x32xf32>
    %c0_10 = arith.constant 0 : index
    %c0_11 = arith.constant 0 : index
    %24 = vector.load %arg6[%c0_10, %c0_11] : memref<1x32xf32, #tpu.memory_space<vmem>>, vector<1x32xf32>
    %25 = arith.truncf %23 : vector<8x32xf32> to vector<8x32xbf16>
    %c0_12 = arith.constant 0 : index
    %c0_13 = arith.constant 0 : index
    %26 = vector.load %arg4[%c0_12, %c0_13] : memref<32x32xbf16, #tpu.memory_space<vmem>>, vector<32x32xbf16>
    %cst_14 = arith.constant dense<0.000000e+00> : vector<8x32xf32>
    %27 = tpu.matmul %25, %26, %cst_14 {dimension_numbers = #tpu.dot_dimension_numbers<[1], [0], [0], [1], [0, 0, 1, 1], [], []>} : vector<8x32xbf16>, vector<32x32xbf16>, vector<8x32xf32> -> vector<8x32xf32>
    %28 = vector.broadcast %24 : vector<1x32xf32> to vector<8x32xf32>
    %29 = arith.addf %27, %28 : vector<8x32xf32>
    %30 = vector.shape_cast %24 : vector<1x32xf32> to vector<1x32xf32>
    %31 = vector.broadcast %30 : vector<1x32xf32> to vector<2x32xf32>
    %32 = vector.extract_strided_slice %29 {offsets = [0, 0], sizes = [6, 32], strides = [1, 1]} : vector<8x32xf32> to vector<6x32xf32>
    %33 = tpu.concatenate %31, %32 in 0 : vector<2x32xf32>, vector<6x32xf32> -> vector<8x32xf32>
    %34 = math.tanh %33 : vector<8x32xf32>
    %35 = vector.extract_strided_slice %31 {offsets = [0, 0], sizes = [1, 32], strides = [1, 1]} : vector<2x32xf32> to vector<1x32xf32>
    %36 = vector.extract_strided_slice %29 {offsets = [0, 0], sizes = [7, 32], strides = [1, 1]} : vector<8x32xf32> to vector<7x32xf32>
    %37 = tpu.concatenate %35, %36 in 0 : vector<1x32xf32>, vector<7x32xf32> -> vector<8x32xf32>
    %38 = arith.truncf %34 : vector<8x32xf32> to vector<8x32xbf16>
    %c0_15 = arith.constant 0 : index
    %c0_16 = arith.constant 0 : index
    %39 = vector.load %arg5[%c0_15, %c0_16] : memref<32x32xbf16, #tpu.memory_space<vmem>>, vector<32x32xbf16>
    %cst_17 = arith.constant dense<0.000000e+00> : vector<8x32xf32>
    %40 = tpu.matmul %38, %39, %cst_17 {dimension_numbers = #tpu.dot_dimension_numbers<[1], [0], [0], [1], [0, 0, 1, 1], [], []>} : vector<8x32xbf16>, vector<32x32xbf16>, vector<8x32xf32> -> vector<8x32xf32>
    %41 = arith.addf %37, %40 : vector<8x32xf32>
    %42 = math.tanh %41 : vector<8x32xf32>
    %43 = arith.truncf %42 : vector<8x32xf32> to vector<8x32xbf16>
    %c0_18 = arith.constant 0 : index
    %c0_19 = arith.constant 0 : index
    %44 = vector.load %arg5[%c0_18, %c0_19] : memref<32x32xbf16, #tpu.memory_space<vmem>>, vector<32x32xbf16>
    %cst_20 = arith.constant dense<0.000000e+00> : vector<8x32xf32>
    %45 = tpu.matmul %43, %44, %cst_20 {dimension_numbers = #tpu.dot_dimension_numbers<[1], [0], [0], [1], [0, 0, 1, 1], [], []>} : vector<8x32xbf16>, vector<32x32xbf16>, vector<8x32xf32> -> vector<8x32xf32>
    %46 = arith.addf %29, %45 : vector<8x32xf32>
    %47 = math.tanh %46 : vector<8x32xf32>
    %48 = arith.addf %1, %47 : vector<8x32xf32>
    %c0_21 = arith.constant 0 : index
    %c0_22 = arith.constant 0 : index
    %c0_23 = arith.constant 0 : index
    %49 = vector.load %arg7[%c0_21, %c0_22, %c0_23] : memref<1x8x32xf32, #tpu.memory_space<vmem>>, vector<1x8x32xf32>
    %50 = vector.shape_cast %49 : vector<1x8x32xf32> to vector<8x32xf32>
    %51 = vector.shape_cast %48 : vector<8x32xf32> to vector<1x8x32xf32>
    tpu.vector_store %arg7[%c0_21, %c0_22, %c0_23], %51 {strides = array<i32>} : memref<1x8x32xf32, #tpu.memory_space<vmem>>, vector<1x8x32xf32>,
    return
  }
  func.func @transform_0(%arg0: i32) -> (i32, i32, i32) {
    %c0_i32 = arith.constant 0 : i32
    %c0_i32_0 = arith.constant 0 : i32
    %c0_i32_1 = arith.constant 0 : i32
    return %arg0, %c0_i32, %c0_i32_0 : i32, i32, i32
  }
  func.func @transform_1(%arg0: i32) -> (i32, i32) {
    %c0_i32 = arith.constant 0 : i32
    %c0_i32_0 = arith.constant 0 : i32
    %c0_i32_1 = arith.constant 0 : i32
    return %c0_i32, %c0_i32_0 : i32, i32
  }
  func.func @transform_2(%arg0: i32) -> (i32, i32) {
    %c0_i32 = arith.constant 0 : i32
    %c0_i32_0 = arith.constant 0 : i32
    %c0_i32_1 = arith.constant 0 : i32
    return %c0_i32, %c0_i32_0 : i32, i32
  }
  func.func @transform_3(%arg0: i32) -> (i32, i32) {
    %c0_i32 = arith.constant 0 : i32
    %c0_i32_0 = arith.constant 0 : i32
    %c0_i32_1 = arith.constant 0 : i32
    return %c0_i32, %c0_i32_0 : i32, i32
  }
  func.func @transform_4(%arg0: i32) -> (i32, i32) {
    %c0_i32 = arith.constant 0 : i32
    %c0_i32_0 = arith.constant 0 : i32
    %c0_i32_1 = arith.constant 0 : i32
    return %c0_i32, %c0_i32_0 : i32, i32
  }
  func.func @transform_5(%arg0: i32) -> (i32, i32) {
    %c0_i32 = arith.constant 0 : i32
    %c0_i32_0 = arith.constant 0 : i32
    %c0_i32_1 = arith.constant 0 : i32
    return %c0_i32, %c0_i32_0 : i32, i32
  }
  func.func @transform_6(%arg0: i32) -> (i32, i32, i32) {
    %c0_i32 = arith.constant 0 : i32
    %c0_i32_0 = arith.constant 0 : i32
    %c0_i32_1 = arith.constant 0 : i32
    return %arg0, %c0_i32, %c0_i32_0 : i32, i32, i32
  }
}

module attributes {stable_mosaic.version = 11 : i64} {
  func.func @local_rnn_kernel(%arg0: i32, %arg1: memref<1x8x32xf32, #tpu.memory_space<vmem>>, %arg2: memref<1x32xf32, #tpu.memory_space<vmem>>, %arg3: memref<1x32xf32, #tpu.memory_space<vmem>>, %arg4: memref<32x32xbf16, #tpu.memory_space<vmem>>, %arg5: memref<32x32xbf16, #tpu.memory_space<vmem>>, %arg6: memref<1x32xf32, #tpu.memory_space<vmem>>, %arg7: memref<1x8x32xf32, #tpu.memory_space<vmem>>) attributes {dimension_semantics = [#tpu.dimension_semantics<parallel>], iteration_bounds = array<i64: 2>, scalar_prefetch = 0 : i64, scratch_operands = 0 : i64, tpu.core_type = #tpu.core_type<tc>, window_params = [{transform_indices = @transform_0, window_bounds = array<i64: 1, 8, 32>}, {pipeline_mode = #tpu.pipeline_mode<synchronous>, transform_indices = @transform_1, window_bounds = array<i64: 1, 32>}, {pipeline_mode = #tpu.pipeline_mode<synchronous>, transform_indices = @transform_2, window_bounds = array<i64: 1, 32>}, {pipeline_mode = #tpu.pipeline_mode<synchronous>, transform_indices = @transform_3, window_bounds = array<i64: 32, 32>}, {pipeline_mode = #tpu.pipeline_mode<synchronous>, transform_indices = @transform_4, window_bounds = array<i64: 32, 32>}, {pipeline_mode = #tpu.pipeline_mode<synchronous>, transform_indices = @transform_5, window_bounds = array<i64: 1, 32>}, {transform_indices = @transform_6, window_bounds = array<i64: 1, 8, 32>}]} {
    %c0 = arith.constant 0 : index
    %c0_0 = arith.constant 0 : index
    %c0_1 = arith.constant 0 : index
    %0 = vector.load %arg1[%c0, %c0_0, %c0_1] : memref<1x8x32xf32, #tpu.memory_space<vmem>>, vector<1x8x32xf32>
    %1 = vector.shape_cast %0 : vector<1x8x32xf32> to vector<8x32xf32>
    %c0_2 = arith.constant 0 : index
    %c0_3 = arith.constant 0 : index
    %2 = vector.load %arg2[%c0_2, %c0_3] : memref<1x32xf32, #tpu.memory_space<vmem>>, vector<1x32xf32>
    %c0_4 = arith.constant 0 : index
    %c0_5 = arith.constant 0 : index
    %3 = vector.load %arg3[%c0_4, %c0_5] : memref<1x32xf32, #tpu.memory_space<vmem>>, vector<1x32xf32>
    %cst = arith.constant dense<0.000000e+00> : vector<8xf32>
    %4 = vector.multi_reduction <add>, %1, %cst [1] : vector<8x32xf32> to vector<8xf32>
    %5 = vector.shape_cast %4 : vector<8xf32> to vector<8x1xf32>
    %cst_6 = arith.constant 3.200000e+01 : f32
    %6 = vector.broadcast %cst_6 : f32 to vector<8x1xf32>
    %7 = arith.divf %5, %6 : vector<8x1xf32>
    %8 = vector.broadcast %7 : vector<8x1xf32> to vector<8x32xf32>
    %9 = arith.subf %1, %8 : vector<8x32xf32>
    %10 = arith.mulf %9, %9 : vector<8x32xf32>
    %cst_7 = arith.constant dense<0.000000e+00> : vector<8xf32>
    %11 = vector.multi_reduction <add>, %10, %cst_7 [1] : vector<8x32xf32> to vector<8xf32>
    %12 = vector.shape_cast %11 : vector<8xf32> to vector<8x1xf32>
    %cst_8 = arith.constant 3.100000e+01 : f32
    %13 = vector.broadcast %cst_8 : f32 to vector<8x1xf32>
    %14 = arith.divf %12, %13 : vector<8x1xf32>
    %15 = math.sqrt %14 : vector<8x1xf32>
    %16 = vector.broadcast %2 : vector<1x32xf32> to vector<8x32xf32>
    %17 = arith.mulf %16, %9 : vector<8x32xf32>
    %cst_9 = arith.constant 9.99999997E-7 : f32
    %18 = vector.broadcast %cst_9 : f32 to vector<8x1xf32>
    %19 = arith.addf %15, %18 : vector<8x1xf32>
    %20 = vector.broadcast %19 : vector<8x1xf32> to vector<8x32xf32>
    %21 = arith.divf %17, %20 : vector<8x32xf32>
    %22 = vector.broadcast %3 : vector<1x32xf32> to vector<8x32xf32>
    %23 = arith.addf %21, %22 : vector<8x32xf32>
    %c0_10 = arith.constant 0 : index
    %c0_11 = arith.constant 0 : index
    %24 = vector.load %arg6[%c0_10, %c0_11] : memref<1x32xf32, #tpu.memory_space<vmem>>, vector<1x32xf32>
    %25 = arith.truncf %23 : vector<8x32xf32> to vector<8x32xbf16>
    %c0_12 = arith.constant 0 : index
    %c0_13 = arith.constant 0 : index
    %26 = vector.load %arg4[%c0_12, %c0_13] : memref<32x32xbf16, #tpu.memory_space<vmem>>, vector<32x32xbf16>
    %cst_14 = arith.constant dense<0.000000e+00> : vector<8x32xf32>
    %27 = tpu.matmul %25, %26, %cst_14 {dimension_numbers = #tpu.dot_dimension_numbers<[1], [0], [0], [1], [0, 0, 1, 1], [], []>} : vector<8x32xbf16>, vector<32x32xbf16>, vector<8x32xf32> -> vector<8x32xf32>
    %28 = vector.broadcast %24 : vector<1x32xf32> to vector<8x32xf32>
    %29 = arith.addf %27, %28 : vector<8x32xf32>
    %30 = vector.shape_cast %24 : vector<1x32xf32> to vector<1x32xf32>
    %31 = vector.broadcast %30 : vector<1x32xf32> to vector<2x32xf32>
    %32 = vector.extract_strided_slice %29 {offsets = [0, 0], sizes = [6, 32], strides = [1, 1]} : vector<8x32xf32> to vector<6x32xf32>
    %33 = tpu.concatenate %31, %32 in 0 : vector<2x32xf32>, vector<6x32xf32> -> vector<8x32xf32>
    %34 = math.tanh %33 : vector<8x32xf32>
    %35 = vector.extract_strided_slice %31 {offsets = [0, 0], sizes = [1, 32], strides = [1, 1]} : vector<2x32xf32> to vector<1x32xf32>
    %36 = vector.extract_strided_slice %29 {offsets = [0, 0], sizes = [7, 32], strides = [1, 1]} : vector<8x32xf32> to vector<7x32xf32>
    %37 = tpu.concatenate %35, %36 in 0 : vector<1x32xf32>, vector<7x32xf32> -> vector<8x32xf32>
    %38 = arith.truncf %34 : vector<8x32xf32> to vector<8x32xbf16>
    %c0_15 = arith.constant 0 : index
    %c0_16 = arith.constant 0 : index
    %39 = vector.load %arg5[%c0_15, %c0_16] : memref<32x32xbf16, #tpu.memory_space<vmem>>, vector<32x32xbf16>
    %cst_17 = arith.constant dense<0.000000e+00> : vector<8x32xf32>
    %40 = tpu.matmul %38, %39, %cst_17 {dimension_numbers = #tpu.dot_dimension_numbers<[1], [0], [0], [1], [0, 0, 1, 1], [], []>} : vector<8x32xbf16>, vector<32x32xbf16>, vector<8x32xf32> -> vector<8x32xf32>
    %41 = arith.addf %37, %40 : vector<8x32xf32>
    %42 = math.tanh %41 : vector<8x32xf32>
    %43 = arith.truncf %42 : vector<8x32xf32> to vector<8x32xbf16>
    %c0_18 = arith.constant 0 : index
    %c0_19 = arith.constant 0 : index
    %44 = vector.load %arg5[%c0_18, %c0_19] : memref<32x32xbf16, #tpu.memory_space<vmem>>, vector<32x32xbf16>
    %cst_20 = arith.constant dense<0.000000e+00> : vector<8x32xf32>
    %45 = tpu.matmul %43, %44, %cst_20 {dimension_numbers = #tpu.dot_dimension_numbers<[1], [0], [0], [1], [0, 0, 1, 1], [], []>} : vector<8x32xbf16>, vector<32x32xbf16>, vector<8x32xf32> -> vector<8x32xf32>
    %46 = arith.addf %29, %45 : vector<8x32xf32>
    %47 = math.tanh %46 : vector<8x32xf32>
    %48 = arith.addf %1, %47 : vector<8x32xf32>
    %c0_21 = arith.constant 0 : index
    %c0_22 = arith.constant 0 : index
    %c0_23 = arith.constant 0 : index
    %49 = vector.load %arg7[%c0_21, %c0_22, %c0_23] : memref<1x8x32xf32, #tpu.memory_space<vmem>>, vector<1x8x32xf32>
    %50 = vector.shape_cast %49 : vector<1x8x32xf32> to vector<8x32xf32>
    %51 = vector.shape_cast %48 : vector<8x32xf32> to vector<1x8x32xf32>
    tpu.vector_store %arg7[%c0_21, %c0_22, %c0_23], %51 {strides = array<i32>} : memref<1x8x32xf32, #tpu.memory_space<vmem>>, vector<1x8x32xf32>,
    return
  }
  func.func @transform_0(%arg0: i32) -> (i32, i32, i32) {
    %c0_i32 = arith.constant 0 : i32
    %c0_i32_0 = arith.constant 0 : i32
    %c0_i32_1 = arith.constant 0 : i32
    return %arg0, %c0_i32, %c0_i32_0 : i32, i32, i32
  }
  func.func @transform_1(%arg0: i32) -> (i32, i32) {
    %c0_i32 = arith.constant 0 : i32
    %c0_i32_0 = arith.constant 0 : i32
    %c0_i32_1 = arith.constant 0 : i32
    return %c0_i32, %c0_i32_0 : i32, i32
  }
  func.func @transform_2(%arg0: i32) -> (i32, i32) {
    %c0_i32 = arith.constant 0 : i32
    %c0_i32_0 = arith.constant 0 : i32
    %c0_i32_1 = arith.constant 0 : i32
    return %c0_i32, %c0_i32_0 : i32, i32
  }
  func.func @transform_3(%arg0: i32) -> (i32, i32) {
    %c0_i32 = arith.constant 0 : i32
    %c0_i32_0 = arith.constant 0 : i32
    %c0_i32_1 = arith.constant 0 : i32
    return %c0_i32, %c0_i32_0 : i32, i32
  }
  func.func @transform_4(%arg0: i32) -> (i32, i32) {
    %c0_i32 = arith.constant 0 : i32
    %c0_i32_0 = arith.constant 0 : i32
    %c0_i32_1 = arith.constant 0 : i32
    return %c0_i32, %c0_i32_0 : i32, i32
  }
  func.func @transform_5(%arg0: i32) -> (i32, i32) {
    %c0_i32 = arith.constant 0 : i32
    %c0_i32_0 = arith.constant 0 : i32
    %c0_i32_1 = arith.constant 0 : i32
    return %c0_i32, %c0_i32_0 : i32, i32
  }
  func.func @transform_6(%arg0: i32) -> (i32, i32, i32) {
    %c0_i32 = arith.constant 0 : i32
    %c0_i32_0 = arith.constant 0 : i32
    %c0_i32_1 = arith.constant 0 : i32
    return %arg0, %c0_i32, %c0_i32_0 : i32, i32, i32
  }
}

module attributes {stable_mosaic.version = 11 : i64} {
  func.func @mha_kernel(%arg0: i32, %arg1: i32, %arg2: memref<1x8x32xf32, #tpu.memory_space<vmem>>, %arg3: memref<1x32xf32, #tpu.memory_space<vmem>>, %arg4: memref<1x32xf32, #tpu.memory_space<vmem>>, %arg5: memref<1x32x8xbf16, #tpu.memory_space<vmem>>, %arg6: memref<1x1x8xf32, #tpu.memory_space<vmem>>, %arg7: memref<1x32x8xbf16, #tpu.memory_space<vmem>>, %arg8: memref<1x1x8xf32, #tpu.memory_space<vmem>>, %arg9: memref<1x32x8xbf16, #tpu.memory_space<vmem>>, %arg10: memref<1x1x8xf32, #tpu.memory_space<vmem>>, %arg11: memref<1x8x32xbf16, #tpu.memory_space<vmem>>, %arg12: memref<1x32xf32, #tpu.memory_space<vmem>>, %arg13: memref<1x8x32xf32, #tpu.memory_space<vmem>>) attributes {dimension_semantics = [#tpu.dimension_semantics<parallel>, #tpu.dimension_semantics<arbitrary>], iteration_bounds = array<i64: 2, 4>, scalar_prefetch = 0 : i64, scratch_operands = 0 : i64, tpu.core_type = #tpu.core_type<tc>, window_params = [{transform_indices = @transform_0, window_bounds = array<i64: 1, 8, 32>}, {pipeline_mode = #tpu.pipeline_mode<synchronous>, transform_indices = @transform_1, window_bounds = array<i64: 1, 32>}, {pipeline_mode = #tpu.pipeline_mode<synchronous>, transform_indices = @transform_2, window_bounds = array<i64: 1, 32>}, {transform_indices = @transform_3, window_bounds = array<i64: 1, 32, 8>}, {transform_indices = @transform_4, window_bounds = array<i64: 1, 1, 8>}, {transform_indices = @transform_5, window_bounds = array<i64: 1, 32, 8>}, {transform_indices = @transform_6, window_bounds = array<i64: 1, 1, 8>}, {transform_indices = @transform_7, window_bounds = array<i64: 1, 32, 8>}, {transform_indices = @transform_8, window_bounds = array<i64: 1, 1, 8>}, {transform_indices = @transform_9, window_bounds = array<i64: 1, 8, 32>}, {pipeline_mode = #tpu.pipeline_mode<synchronous>, transform_indices = @transform_10, window_bounds = array<i64: 1, 32>}, {transform_indices = @transform_11, window_bounds = array<i64: 1, 8, 32>}]} {
    %c0 = arith.constant 0 : index
    %c0_0 = arith.constant 0 : index
    %c0_1 = arith.constant 0 : index
    %0 = vector.load %arg2[%c0, %c0_0, %c0_1] : memref<1x8x32xf32, #tpu.memory_space<vmem>>, vector<1x8x32xf32>
    %1 = vector.shape_cast %0 : vector<1x8x32xf32> to vector<8x32xf32>
    %c0_2 = arith.constant 0 : index
    %c0_3 = arith.constant 0 : index
    %2 = vector.load %arg3[%c0_2, %c0_3] : memref<1x32xf32, #tpu.memory_space<vmem>>, vector<1x32xf32>
    %c0_4 = arith.constant 0 : index
    %c0_5 = arith.constant 0 : index
    %3 = vector.load %arg4[%c0_4, %c0_5] : memref<1x32xf32, #tpu.memory_space<vmem>>, vector<1x32xf32>
    %cst = arith.constant dense<0.000000e+00> : vector<8xf32>
    %4 = vector.multi_reduction <add>, %1, %cst [1] : vector<8x32xf32> to vector<8xf32>
    %5 = vector.shape_cast %4 : vector<8xf32> to vector<8x1xf32>
    %cst_6 = arith.constant 3.200000e+01 : f32
    %6 = vector.broadcast %cst_6 : f32 to vector<8x1xf32>
    %7 = arith.divf %5, %6 : vector<8x1xf32>
    %8 = vector.broadcast %7 : vector<8x1xf32> to vector<8x32xf32>
    %9 = arith.subf %1, %8 : vector<8x32xf32>
    %10 = arith.mulf %9, %9 : vector<8x32xf32>
    %cst_7 = arith.constant dense<0.000000e+00> : vector<8xf32>
    %11 = vector.multi_reduction <add>, %10, %cst_7 [1] : vector<8x32xf32> to vector<8xf32>
    %12 = vector.shape_cast %11 : vector<8xf32> to vector<8x1xf32>
    %cst_8 = arith.constant 3.100000e+01 : f32
    %13 = vector.broadcast %cst_8 : f32 to vector<8x1xf32>
    %14 = arith.divf %12, %13 : vector<8x1xf32>
    %15 = math.sqrt %14 : vector<8x1xf32>
    %16 = vector.broadcast %2 : vector<1x32xf32> to vector<8x32xf32>
    %17 = arith.mulf %16, %9 : vector<8x32xf32>
    %cst_9 = arith.constant 9.99999997E-7 : f32
    %18 = vector.broadcast %cst_9 : f32 to vector<8x1xf32>
    %19 = arith.addf %15, %18 : vector<8x1xf32>
    %20 = vector.broadcast %19 : vector<8x1xf32> to vector<8x32xf32>
    %21 = arith.divf %17, %20 : vector<8x32xf32>
    %22 = vector.broadcast %3 : vector<1x32xf32> to vector<8x32xf32>
    %23 = arith.addf %21, %22 : vector<8x32xf32>
    %24 = arith.truncf %23 : vector<8x32xf32> to vector<8x32xbf16>
    %c0_10 = arith.constant 0 : index
    %c0_11 = arith.constant 0 : index
    %c0_12 = arith.constant 0 : index
    %25 = vector.load %arg5[%c0_10, %c0_11, %c0_12] : memref<1x32x8xbf16, #tpu.memory_space<vmem>>, vector<1x32x8xbf16>
    %26 = vector.shape_cast %25 : vector<1x32x8xbf16> to vector<32x8xbf16>
    %cst_13 = arith.constant dense<0.000000e+00> : vector<8x8xf32>
    %27 = tpu.matmul %24, %26, %cst_13 {dimension_numbers = #tpu.dot_dimension_numbers<[1], [0], [0], [1], [0, 0, 1, 1], [], []>} : vector<8x32xbf16>, vector<32x8xbf16>, vector<8x8xf32> -> vector<8x8xf32>
    %c0_14 = arith.constant 0 : index
    %c0_15 = arith.constant 0 : index
    %c0_16 = arith.constant 0 : index
    %28 = vector.load %arg6[%c0_14, %c0_15, %c0_16] : memref<1x1x8xf32, #tpu.memory_space<vmem>>, vector<1x1x8xf32>
    %29 = vector.shape_cast %28 : vector<1x1x8xf32> to vector<1x8xf32>
    %30 = vector.broadcast %29 : vector<1x8xf32> to vector<8x8xf32>
    %31 = arith.addf %27, %30 : vector<8x8xf32>
    %c0_17 = arith.constant 0 : index
    %c0_18 = arith.constant 0 : index
    %c0_19 = arith.constant 0 : index
    %32 = vector.load %arg7[%c0_17, %c0_18, %c0_19] : memref<1x32x8xbf16, #tpu.memory_space<vmem>>, vector<1x32x8xbf16>
    %33 = vector.shape_cast %32 : vector<1x32x8xbf16> to vector<32x8xbf16>
    %cst_20 = arith.constant dense<0.000000e+00> : vector<8x8xf32>
    %34 = tpu.matmul %24, %33, %cst_20 {dimension_numbers = #tpu.dot_dimension_numbers<[1], [0], [0], [1], [0, 0, 1, 1], [], []>} : vector<8x32xbf16>, vector<32x8xbf16>, vector<8x8xf32> -> vector<8x8xf32>
    %c0_21 = arith.constant 0 : index
    %c0_22 = arith.constant 0 : index
    %c0_23 = arith.constant 0 : index
    %35 = vector.load %arg8[%c0_21, %c0_22, %c0_23] : memref<1x1x8xf32, #tpu.memory_space<vmem>>, vector<1x1x8xf32>
    %36 = vector.shape_cast %35 : vector<1x1x8xf32> to vector<1x8xf32>
    %37 = vector.broadcast %36 : vector<1x8xf32> to vector<8x8xf32>
    %38 = arith.addf %34, %37 : vector<8x8xf32>
    %c0_24 = arith.constant 0 : index
    %c0_25 = arith.constant 0 : index
    %c0_26 = arith.constant 0 : index
    %39 = vector.load %arg9[%c0_24, %c0_25, %c0_26] : memref<1x32x8xbf16, #tpu.memory_space<vmem>>, vector<1x32x8xbf16>
    %40 = vector.shape_cast %39 : vector<1x32x8xbf16> to vector<32x8xbf16>
    %cst_27 = arith.constant dense<0.000000e+00> : vector<8x8xf32>
    %41 = tpu.matmul %24, %40, %cst_27 {dimension_numbers = #tpu.dot_dimension_numbers<[1], [0], [0], [1], [0, 0, 1, 1], [], []>} : vector<8x32xbf16>, vector<32x8xbf16>, vector<8x8xf32> -> vector<8x8xf32>
    %c0_28 = arith.constant 0 : index
    %c0_29 = arith.constant 0 : index
    %c0_30 = arith.constant 0 : index
    %42 = vector.load %arg10[%c0_28, %c0_29, %c0_30] : memref<1x1x8xf32, #tpu.memory_space<vmem>>, vector<1x1x8xf32>
    %43 = vector.shape_cast %42 : vector<1x1x8xf32> to vector<1x8xf32>
    %44 = vector.broadcast %43 : vector<1x8xf32> to vector<8x8xf32>
    %45 = arith.addf %41, %44 : vector<8x8xf32>
    %46 = tpu.iota {dimensions = array<i32: 0>} : vector<8x8xi32>
    %47 = tpu.iota {dimensions = array<i32: 1>} : vector<8x8xi32>
    %48 = arith.cmpi sle, %47, %46 : vector<8x8xi32>
    %cst_31 = arith.constant 0.000000e+00 : f32
    %cst_32 = arith.constant -1.000000e+09 : f32
    %49 = vector.broadcast %cst_31 : f32 to vector<8x8xf32>
    %50 = vector.broadcast %cst_32 : f32 to vector<8x8xf32>
    %51 = arith.select %48, %49, %50 : vector<8x8xi1>, vector<8x8xf32>
    %52 = arith.truncf %31 : vector<8x8xf32> to vector<8x8xbf16>
    %53 = arith.truncf %38 : vector<8x8xf32> to vector<8x8xbf16>
    %cst_33 = arith.constant dense<0.000000e+00> : vector<8x8xf32>
    %54 = tpu.matmul %52, %53, %cst_33 {dimension_numbers = #tpu.dot_dimension_numbers<[1], [1], [0], [0], [0, 0, 1, 0], [], []>} : vector<8x8xbf16>, vector<8x8xbf16>, vector<8x8xf32> -> vector<8x8xf32>
    %cst_34 = arith.constant 0.353553385 : f32
    %55 = vector.broadcast %cst_34 : f32 to vector<8x8xf32>
    %56 = arith.mulf %54, %55 : vector<8x8xf32>
    %57 = arith.addf %56, %51 : vector<8x8xf32>
    %cst_35 = arith.constant dense<0xFF800000> : vector<8xf32>
    %58 = vector.multi_reduction <maximumf>, %57, %cst_35 [1] : vector<8x8xf32> to vector<8xf32>
    %59 = vector.shape_cast %58 : vector<8xf32> to vector<8x1xf32>
    %60 = vector.broadcast %59 : vector<8x1xf32> to vector<8x8xf32>
    %61 = arith.subf %57, %60 : vector<8x8xf32>
    %62 = math.exp %61 : vector<8x8xf32>
    %cst_36 = arith.constant dense<0.000000e+00> : vector<8xf32>
    %63 = vector.multi_reduction <add>, %62, %cst_36 [1] : vector<8x8xf32> to vector<8xf32>
    %64 = vector.shape_cast %63 : vector<8xf32> to vector<8x1xf32>
    %65 = tpu.reciprocal %64 {approx = true} : vector<8x1xf32> -> vector<8x1xf32>
    %66 = vector.broadcast %65 : vector<8x1xf32> to vector<8x8xf32>
    %67 = arith.mulf %62, %66 : vector<8x8xf32>
    %68 = arith.truncf %67 : vector<8x8xf32> to vector<8x8xbf16>
    %69 = arith.truncf %45 : vector<8x8xf32> to vector<8x8xbf16>
    %cst_37 = arith.constant dense<0.000000e+00> : vector<8x8xf32>
    %70 = tpu.matmul %68, %69, %cst_37 {dimension_numbers = #tpu.dot_dimension_numbers<[1], [0], [0], [1], [0, 0, 1, 1], [], []>} : vector<8x8xbf16>, vector<8x8xbf16>, vector<8x8xf32> -> vector<8x8xf32>
    %71 = arith.truncf %70 : vector<8x8xf32> to vector<8x8xbf16>
    %c0_38 = arith.constant 0 : index
    %c0_39 = arith.constant 0 : index
    %c0_40 = arith.constant 0 : index
    %72 = vector.load %arg11[%c0_38, %c0_39, %c0_40] : memref<1x8x32xbf16, #tpu.memory_space<vmem>>, vector<1x8x32xbf16>
    %73 = vector.shape_cast %72 : vector<1x8x32xbf16> to vector<8x32xbf16>
    %cst_41 = arith.constant dense<0.000000e+00> : vector<8x32xf32>
    %74 = tpu.matmul %71, %73, %cst_41 {dimension_numbers = #tpu.dot_dimension_numbers<[1], [0], [0], [1], [0, 0, 1, 1], [], []>} : vector<8x8xbf16>, vector<8x32xbf16>, vector<8x32xf32> -> vector<8x32xf32>
    %c0_i32 = arith.constant 0 : i32
    %75 = arith.cmpi eq, %arg1, %c0_i32 : i32
    %76 = arith.extui %75 : i1 to i32
    %c0_i32_42 = arith.constant 0 : i32
    %77 = arith.cmpi ne, %76, %c0_i32_42 : i32
    scf.if %77 {
      %c0_49 = arith.constant 0 : index
      %c0_50 = arith.constant 0 : index
      %84 = vector.load %arg12[%c0_49, %c0_50] : memref<1x32xf32, #tpu.memory_space<vmem>>, vector<1x32xf32>
      %85 = vector.broadcast %84 : vector<1x32xf32> to vector<8x32xf32>
      %86 = arith.addf %1, %85 : vector<8x32xf32>
      %c0_51 = arith.constant 0 : index
      %c0_52 = arith.constant 0 : index
      %c0_53 = arith.constant 0 : index
      %87 = vector.load %arg13[%c0_51, %c0_52, %c0_53] : memref<1x8x32xf32, #tpu.memory_space<vmem>>, vector<1x8x32xf32>
      %88 = vector.shape_cast %87 : vector<1x8x32xf32> to vector<8x32xf32>
      %89 = vector.shape_cast %86 : vector<8x32xf32> to vector<1x8x32xf32>
      tpu.vector_store %arg13[%c0_51, %c0_52, %c0_53], %89 {strides = array<i32>} : memref<1x8x32xf32, #tpu.memory_space<vmem>>, vector<1x8x32xf32>,
    } else {
    }
    %c0_43 = arith.constant 0 : index
    %c0_44 = arith.constant 0 : index
    %c0_45 = arith.constant 0 : index
    %78 = vector.load %arg13[%c0_43, %c0_44, %c0_45] : memref<1x8x32xf32, #tpu.memory_space<vmem>>, vector<1x8x32xf32>
    %79 = vector.shape_cast %78 : vector<1x8x32xf32> to vector<8x32xf32>
    %80 = arith.addf %79, %74 : vector<8x32xf32>
    %c0_46 = arith.constant 0 : index
    %c0_47 = arith.constant 0 : index
    %c0_48 = arith.constant 0 : index
    %81 = vector.load %arg13[%c0_46, %c0_47, %c0_48] : memref<1x8x32xf32, #tpu.memory_space<vmem>>, vector<1x8x32xf32>
    %82 = vector.shape_cast %81 : vector<1x8x32xf32> to vector<8x32xf32>
    %83 = vector.shape_cast %80 : vector<8x32xf32> to vector<1x8x32xf32>
    tpu.vector_store %arg13[%c0_46, %c0_47, %c0_48], %83 {strides = array<i32>} : memref<1x8x32xf32, #tpu.memory_space<vmem>>, vector<1x8x32xf32>,
    return
  }
  func.func @transform_0(%arg0: i32, %arg1: i32) -> (i32, i32, i32) {
    %c0_i32 = arith.constant 0 : i32
    %c0_i32_0 = arith.constant 0 : i32
    %c0_i32_1 = arith.constant 0 : i32
    return %arg0, %c0_i32, %c0_i32_0 : i32, i32, i32
  }
  func.func @transform_1(%arg0: i32, %arg1: i32) -> (i32, i32) {
    %c0_i32 = arith.constant 0 : i32
    %c0_i32_0 = arith.constant 0 : i32
    %c0_i32_1 = arith.constant 0 : i32
    return %c0_i32, %c0_i32_0 : i32, i32
  }
  func.func @transform_2(%arg0: i32, %arg1: i32) -> (i32, i32) {
    %c0_i32 = arith.constant 0 : i32
    %c0_i32_0 = arith.constant 0 : i32
    %c0_i32_1 = arith.constant 0 : i32
    return %c0_i32, %c0_i32_0 : i32, i32
  }
  func.func @transform_3(%arg0: i32, %arg1: i32) -> (i32, i32, i32) {
    %c0_i32 = arith.constant 0 : i32
    %c0_i32_0 = arith.constant 0 : i32
    %c0_i32_1 = arith.constant 0 : i32
    return %arg1, %c0_i32, %c0_i32_0 : i32, i32, i32
  }
  func.func @transform_4(%arg0: i32, %arg1: i32) -> (i32, i32, i32) {
    %c0_i32 = arith.constant 0 : i32
    %c0_i32_0 = arith.constant 0 : i32
    %c0_i32_1 = arith.constant 0 : i32
    return %arg1, %c0_i32, %c0_i32_0 : i32, i32, i32
  }
  func.func @transform_5(%arg0: i32, %arg1: i32) -> (i32, i32, i32) {
    %c0_i32 = arith.constant 0 : i32
    %c0_i32_0 = arith.constant 0 : i32
    %c0_i32_1 = arith.constant 0 : i32
    return %arg1, %c0_i32, %c0_i32_0 : i32, i32, i32
  }
  func.func @transform_6(%arg0: i32, %arg1: i32) -> (i32, i32, i32) {
    %c0_i32 = arith.constant 0 : i32
    %c0_i32_0 = arith.constant 0 : i32
    %c0_i32_1 = arith.constant 0 : i32
    return %arg1, %c0_i32, %c0_i32_0 : i32, i32, i32
  }
  func.func @transform_7(%arg0: i32, %arg1: i32) -> (i32, i32, i32) {
    %c0_i32 = arith.constant 0 : i32
    %c0_i32_0 = arith.constant 0 : i32
    %c0_i32_1 = arith.constant 0 : i32
    return %arg1, %c0_i32, %c0_i32_0 : i32, i32, i32
  }
  func.func @transform_8(%arg0: i32, %arg1: i32) -> (i32, i32, i32) {
    %c0_i32 = arith.constant 0 : i32
    %c0_i32_0 = arith.constant 0 : i32
    %c0_i32_1 = arith.constant 0 : i32
    return %arg1, %c0_i32, %c0_i32_0 : i32, i32, i32
  }
  func.func @transform_9(%arg0: i32, %arg1: i32) -> (i32, i32, i32) {
    %c0_i32 = arith.constant 0 : i32
    %c0_i32_0 = arith.constant 0 : i32
    %c0_i32_1 = arith.constant 0 : i32
    return %arg1, %c0_i32, %c0_i32_0 : i32, i32, i32
  }
  func.func @transform_10(%arg0: i32, %arg1: i32) -> (i32, i32) {
    %c0_i32 = arith.constant 0 : i32
    %c0_i32_0 = arith.constant 0 : i32
    %c0_i32_1 = arith.constant 0 : i32
    return %c0_i32, %c0_i32_0 : i32, i32
  }
  func.func @transform_11(%arg0: i32, %arg1: i32) -> (i32, i32, i32) {
    %c0_i32 = arith.constant 0 : i32
    %c0_i32_0 = arith.constant 0 : i32
    %c0_i32_1 = arith.constant 0 : i32
    return %arg0, %c0_i32, %c0_i32_0 : i32, i32, i32
  }
}

module attributes {stable_mosaic.version = 11 : i64} {
  func.func @ffn_kernel(%arg0: i32, %arg1: memref<8x32xf32, #tpu.memory_space<vmem>>, %arg2: memref<1x32xf32, #tpu.memory_space<vmem>>, %arg3: memref<1x32xf32, #tpu.memory_space<vmem>>, %arg4: memref<32x128xbf16, #tpu.memory_space<vmem>>, %arg5: memref<1x128xf32, #tpu.memory_space<vmem>>, %arg6: memref<128x32xbf16, #tpu.memory_space<vmem>>, %arg7: memref<1x32xf32, #tpu.memory_space<vmem>>, %arg8: memref<8x32xf32, #tpu.memory_space<vmem>>) attributes {dimension_semantics = [#tpu.dimension_semantics<parallel>], iteration_bounds = array<i64: 2>, scalar_prefetch = 0 : i64, scratch_operands = 0 : i64, tpu.core_type = #tpu.core_type<tc>, window_params = [{transform_indices = @transform_0, window_bounds = array<i64: 8, 32>}, {pipeline_mode = #tpu.pipeline_mode<synchronous>, transform_indices = @transform_1, window_bounds = array<i64: 1, 32>}, {pipeline_mode = #tpu.pipeline_mode<synchronous>, transform_indices = @transform_2, window_bounds = array<i64: 1, 32>}, {pipeline_mode = #tpu.pipeline_mode<synchronous>, transform_indices = @transform_3, window_bounds = array<i64: 32, 128>}, {pipeline_mode = #tpu.pipeline_mode<synchronous>, transform_indices = @transform_4, window_bounds = array<i64: 1, 128>}, {pipeline_mode = #tpu.pipeline_mode<synchronous>, transform_indices = @transform_5, window_bounds = array<i64: 128, 32>}, {pipeline_mode = #tpu.pipeline_mode<synchronous>, transform_indices = @transform_6, window_bounds = array<i64: 1, 32>}, {transform_indices = @transform_7, window_bounds = array<i64: 8, 32>}]} {
    %c0 = arith.constant 0 : index
    %c0_0 = arith.constant 0 : index
    %0 = vector.load %arg1[%c0, %c0_0] : memref<8x32xf32, #tpu.memory_space<vmem>>, vector<8x32xf32>
    %c0_1 = arith.constant 0 : index
    %c0_2 = arith.constant 0 : index
    %1 = vector.load %arg2[%c0_1, %c0_2] : memref<1x32xf32, #tpu.memory_space<vmem>>, vector<1x32xf32>
    %c0_3 = arith.constant 0 : index
    %c0_4 = arith.constant 0 : index
    %2 = vector.load %arg3[%c0_3, %c0_4] : memref<1x32xf32, #tpu.memory_space<vmem>>, vector<1x32xf32>
    %cst = arith.constant dense<0.000000e+00> : vector<8xf32>
    %3 = vector.multi_reduction <add>, %0, %cst [1] : vector<8x32xf32> to vector<8xf32>
    %4 = vector.shape_cast %3 : vector<8xf32> to vector<8x1xf32>
    %cst_5 = arith.constant 3.200000e+01 : f32
    %5 = vector.broadcast %cst_5 : f32 to vector<8x1xf32>
    %6 = arith.divf %4, %5 : vector<8x1xf32>
    %7 = vector.broadcast %6 : vector<8x1xf32> to vector<8x32xf32>
    %8 = arith.subf %0, %7 : vector<8x32xf32>
    %9 = arith.mulf %8, %8 : vector<8x32xf32>
    %cst_6 = arith.constant dense<0.000000e+00> : vector<8xf32>
    %10 = vector.multi_reduction <add>, %9, %cst_6 [1] : vector<8x32xf32> to vector<8xf32>
    %11 = vector.shape_cast %10 : vector<8xf32> to vector<8x1xf32>
    %cst_7 = arith.constant 3.100000e+01 : f32
    %12 = vector.broadcast %cst_7 : f32 to vector<8x1xf32>
    %13 = arith.divf %11, %12 : vector<8x1xf32>
    %14 = math.sqrt %13 : vector<8x1xf32>
    %15 = vector.broadcast %1 : vector<1x32xf32> to vector<8x32xf32>
    %16 = arith.mulf %15, %8 : vector<8x32xf32>
    %cst_8 = arith.constant 9.99999997E-7 : f32
    %17 = vector.broadcast %cst_8 : f32 to vector<8x1xf32>
    %18 = arith.addf %14, %17 : vector<8x1xf32>
    %19 = vector.broadcast %18 : vector<8x1xf32> to vector<8x32xf32>
    %20 = arith.divf %16, %19 : vector<8x32xf32>
    %21 = vector.broadcast %2 : vector<1x32xf32> to vector<8x32xf32>
    %22 = arith.addf %20, %21 : vector<8x32xf32>
    %23 = arith.truncf %22 : vector<8x32xf32> to vector<8x32xbf16>
    %c0_9 = arith.constant 0 : index
    %c0_10 = arith.constant 0 : index
    %24 = vector.load %arg4[%c0_9, %c0_10] : memref<32x128xbf16, #tpu.memory_space<vmem>>, vector<32x128xbf16>
    %cst_11 = arith.constant dense<0.000000e+00> : vector<8x128xf32>
    %25 = tpu.matmul %23, %24, %cst_11 {dimension_numbers = #tpu.dot_dimension_numbers<[1], [0], [0], [1], [0, 0, 1, 1], [], []>} : vector<8x32xbf16>, vector<32x128xbf16>, vector<8x128xf32> -> vector<8x128xf32>
    %c0_12 = arith.constant 0 : index
    %c0_13 = arith.constant 0 : index
    %26 = vector.load %arg5[%c0_12, %c0_13] : memref<1x128xf32, #tpu.memory_space<vmem>>, vector<1x128xf32>
    %27 = vector.broadcast %26 : vector<1x128xf32> to vector<8x128xf32>
    %28 = arith.addf %25, %27 : vector<8x128xf32>
    %cst_14 = arith.constant 0.000000e+00 : f32
    %29 = vector.broadcast %cst_14 : f32 to vector<8x128xf32>
    %30 = arith.maximumf %28, %29 : vector<8x128xf32>
    %31 = arith.truncf %30 : vector<8x128xf32> to vector<8x128xbf16>
    %c0_15 = arith.constant 0 : index
    %c0_16 = arith.constant 0 : index
    %32 = vector.load %arg6[%c0_15, %c0_16] : memref<128x32xbf16, #tpu.memory_space<vmem>>, vector<128x32xbf16>
    %cst_17 = arith.constant dense<0.000000e+00> : vector<8x32xf32>
    %33 = tpu.matmul %31, %32, %cst_17 {dimension_numbers = #tpu.dot_dimension_numbers<[1], [0], [0], [1], [0, 0, 1, 1], [], []>} : vector<8x128xbf16>, vector<128x32xbf16>, vector<8x32xf32> -> vector<8x32xf32>
    %c0_18 = arith.constant 0 : index
    %c0_19 = arith.constant 0 : index
    %34 = vector.load %arg7[%c0_18, %c0_19] : memref<1x32xf32, #tpu.memory_space<vmem>>, vector<1x32xf32>
    %35 = vector.broadcast %34 : vector<1x32xf32> to vector<8x32xf32>
    %36 = arith.addf %33, %35 : vector<8x32xf32>
    %37 = arith.addf %0, %36 : vector<8x32xf32>
    %c0_20 = arith.constant 0 : index
    %c0_21 = arith.constant 0 : index
    %38 = vector.load %arg8[%c0_20, %c0_21] : memref<8x32xf32, #tpu.memory_space<vmem>>, vector<8x32xf32>
    tpu.vector_store %arg8[%c0_20, %c0_21], %37 {strides = array<i32>} : memref<8x32xf32, #tpu.memory_space<vmem>>, vector<8x32xf32>,
    return
  }
  func.func @transform_0(%arg0: i32) -> (i32, i32) {
    %c0_i32 = arith.constant 0 : i32
    %c0_i32_0 = arith.constant 0 : i32
    return %arg0, %c0_i32 : i32, i32
  }
  func.func @transform_1(%arg0: i32) -> (i32, i32) {
    %c0_i32 = arith.constant 0 : i32
    %c0_i32_0 = arith.constant 0 : i32
    %c0_i32_1 = arith.constant 0 : i32
    return %c0_i32, %c0_i32_0 : i32, i32
  }
  func.func @transform_2(%arg0: i32) -> (i32, i32) {
    %c0_i32 = arith.constant 0 : i32
    %c0_i32_0 = arith.constant 0 : i32
    %c0_i32_1 = arith.constant 0 : i32
    return %c0_i32, %c0_i32_0 : i32, i32
  }
  func.func @transform_3(%arg0: i32) -> (i32, i32) {
    %c0_i32 = arith.constant 0 : i32
    %c0_i32_0 = arith.constant 0 : i32
    %c0_i32_1 = arith.constant 0 : i32
    return %c0_i32, %c0_i32_0 : i32, i32
  }
  func.func @transform_4(%arg0: i32) -> (i32, i32) {
    %c0_i32 = arith.constant 0 : i32
    %c0_i32_0 = arith.constant 0 : i32
    %c0_i32_1 = arith.constant 0 : i32
    return %c0_i32, %c0_i32_0 : i32, i32
  }
  func.func @transform_5(%arg0: i32) -> (i32, i32) {
    %c0_i32 = arith.constant 0 : i32
    %c0_i32_0 = arith.constant 0 : i32
    %c0_i32_1 = arith.constant 0 : i32
    return %c0_i32, %c0_i32_0 : i32, i32
  }
  func.func @transform_6(%arg0: i32) -> (i32, i32) {
    %c0_i32 = arith.constant 0 : i32
    %c0_i32_0 = arith.constant 0 : i32
    %c0_i32_1 = arith.constant 0 : i32
    return %c0_i32, %c0_i32_0 : i32, i32
  }
  func.func @transform_7(%arg0: i32) -> (i32, i32) {
    %c0_i32 = arith.constant 0 : i32
    %c0_i32_0 = arith.constant 0 : i32
    return %arg0, %c0_i32 : i32, i32
  }
}

</mosaic_0001>

<bundles_post_ra>
// kernel: block_forward.4
= control target key start
LH: loop header
LB: loop body
LE: loop exit
PB: predicated region body
PF: predicated region fallthrough
CT: control target
= control target key end

     0   :  { %11 = vsyncpa [#allocation3], 0  ;;  %s877_s0 = inlined_call_operand.vmem [shape: f32[2,8,32], index: 0, kind: input, shape index: {}, may-alias: {0,6}]   ;;  %s878_s1 = inlined_call_operand.vmem [shape: f32[1,32], index: 1, kind: input, shape index: {}]   ;;  %s879_s2 = inlined_call_operand.hbm [shape: f32[1,32], index: 2, kind: input, shape index: {}]   ;;  %s880_s3 = inlined_call_operand.vmem [shape: bf16[32,32], index: 3, kind: input, shape index: {}]   ;;  %s881_s4 = inlined_call_operand.hbm [shape: bf16[32,32], index: 4, kind: input, shape index: {}]   ;;  %s882_s5 = inlined_call_operand.hbm [shape: f32[1,32], index: 5, kind: input, shape index: {}]   ;;  %s883_s6 = inlined_call_operand.vmem [shape: f32[2,8,32], index: 6, kind: output, shape index: {}, may-alias: {0,6}]  }
   0x1   :  { %12 = vsyncpa [#allocation5], 0  ;;  %s791_s21 = smov 0  }
   0x2 LB: > { %s209_s24 = sshll.u32 %s881_s4, 4  ;;  %s800_s25 = sadd.s32 4294967295, %s747_s21   ;;  %s747_s21 = sphi %s791_s21, %s18_s21   ;;  %s210_s24 = int_to_ptr.hbm [resolvable:$true] %s209_s24 }
   0x3   : > { %p547_p0 = scmp.ge.s32.totalorder %s747_s21, 1  ;;  %p180_p1 = scmp.lt.s32.totalorder %s747_s21, 3 }
   0x4   : > { %p605_p2 = scmp.eq.s32.totalorder %s800_s25, 0  ;;  %s749_s27 = smov [#allocation4]  }
   0x5   : > { %p805_p3 = pnand %p547_p0, %p180_p1  ;;  %s211_s28 = sshll.u32 %s749_s27, 4  ;;  %s212_s28 = int_to_ptr.vmem [resolvable:$true] %s211_s28 }
   0x6   : > { %s195_s7 = sshll.u32 %s879_s2, 4  ;;  %s750_s9 = smov [#allocation2]   ;;  %s196_s7 = int_to_ptr.hbm [resolvable:$true] %s195_s7 }
   0x7   : > { %p595_p4 = pneg %p805_p3  ;;  %s197_s10 = sshll.u32 %s750_s9, 4  ;;  %s198_s10 = int_to_ptr.vmem [resolvable:$true] %s197_s10 }
   0x8   : > { %s224_s13 = sshll.u32 %s882_s5, 4  ;;  %s751_s14 = smov 64   ;;  %s225_s13 = int_to_ptr.hbm [resolvable:$true] %s224_s13 }
   0x9   : > { %p816_p5 = pnand %p605_p2, %p595_p4  ;;  %s752_s15 = smov 4  }
   0xa   : > { %s753_s16 = smov [#allocation6]   ;;  %246 = sbr.rel (%p805_p3) target bundleno = 733 (0x2dd), region = 44 }
   0xb   : > { %601 = dma.hbm_to_vmem [thread:$0]  (!%p816_p5), %s210_s24, 256, %s212_s28, [#allocation5], %s751_s14, %s751_s14, %s752_s15  }
   0xc   : > { %598 = dma.hbm_to_vmem [thread:$0]  (!%p816_p5), %s196_s7, 16, %s198_s10, [#allocation3]  }
   0xd   : > { %s226_s17 = sshll.u32 %s753_s16, 4  ;;  %s227_s17 = int_to_ptr.vmem [resolvable:$true] %s226_s17 }
   0xe   : > { %604 = dma.hbm_to_vmem [thread:$0]  (!%p816_p5), %s225_s13, 16, %s227_s17, [#allocation5]  }
   0xf   : > { %738 = dma.done.wait (%p605_p2), [#allocation3], 16  }
  0x10   : > { %740 = vsyncadd (%p605_p2), [#allocation3], 4294967280 }
  0x11   : > { %742 = dma.done.wait (%p605_p2), [#allocation5], 272  }
  0x12   : > { %744 = vsyncadd (%p605_p2), [#allocation5], 4294967024  ;;  %p285_p6 = scmp.lt.s32.totalorder %s800_s25, 1  ;;  %vm297_vm0 = vcmask 261120   ;;  %v754_v2 = vmov 32.0   ;;  %v755_v14 = vmov 31.0  }
  0x13   : > { %629 = vrcp.f32 %v754_v2  ;;  %v580_v19 = vld [vmem:[%s880_s3 + $0x8] sm:$0xff]  ;;  %v579_v20 = vld [vmem:[%s880_s3] sm:$0xff]  ;;  %v628_v54 = vld [vmem:[#allocation6] ss:$0 sm:$0xff]  ;;  %vm398_vm9 = vcmask 1041408   ;;  %vm403_vm10 = vcmask 1040384  }
  0x14   : > { %s887_s25 = smov (!%p285_p6, %s800_s25), 1  ;;  %631 = vrcp.f32 %v755_v14  ;;  %388 = vmatpush.bf16.msra.mxu0 %v580_v19  ;;  %v626_v40 = vld [vmem:[%s878_s1] ss:$0 sm:$0xff]  ;;  %v582_v52 = vld [vmem:[#allocation4 + $0x8] sm:$0xff]  ;;  %v581_v53 = vld [vmem:[#allocation4] sm:$0xff] }
  0x15   : > { %s556_s18 = sshll.u32 %s887_s25, 3  ;;  %v627_v47 = vld [vmem:[#allocation2] ss:$0 sm:$0xff]  ;;  %431 = vmatpush.bf16.msra.mxu1 %v582_v52  ;;  %450 = vmatpush.bf16.msra.mxu2 %v582_v52  ;;  %v358_v63 = vld [vmem:[#allocation6] sm:$0x1] }
  0x16   : > { %s288_s22 = scalar_lea.vmem %s877_s0, %s556_s18  ;;  %s292_s8 = scalar_lea.vmem %s883_s6, %s556_s18 }
  0x17   : > { %v849_v0 = vld [vmem:[%s288_s22] sm:$0xff] }
  0x18   : > { %v298_v1 = vsel %vm297_vm0, %v849_v0, 0.0  ;;  %389 = vmatpush.bf16.msra.mxu0 %v579_v20 }
  0x19   : > { %299 = vadd.xlane.f32.xlu0 %v298_v1  ;;  %v630_v3 = vpop.eup %629  ;;  %432 = vmatpush.bf16.msra.mxu1 %v581_v53 }
  0x1a   : > { %v302_v4 = vmul.f32 32.0, %v630_v3  ;;  %vm306_vm1 = vweird.f32 %v630_v3  ;;  %v632_v15 = vpop.eup %631  ;;  %451 = vmatpush.bf16.msra.mxu2 %v581_v53 }
  0x1b   : > { %v315_v16 = vmul.f32 31.0, %v632_v15  ;;  %vm319_vm2 = vweird.f32 %v632_v15 }
  0x1c   : > { %v303_v5 = vsub.f32 1.0, %v302_v4 }
  0x1d   : > { %v316_v17 = vsub.f32 1.0, %v315_v16 }
  0x1e   : > { %v304_v6 = vmul.f32 %v630_v3, %v303_v5 }
  0x1f   : > { %v317_v18 = vmul.f32 %v632_v15, %v316_v17 }
  0x20   : > { %v305_v7 = vadd.f32 %v630_v3, %v304_v6 }
  0x21   : > { %v318_v21 = vadd.f32 %v632_v15, %v317_v18 }
  0x22   : > { %v307_v8 = vsel %vm306_vm1, %v630_v3, %v305_v7 }
  0x23   : > { %v320_v22 = vsel %vm319_vm2, %v632_v15, %v318_v21 }
  0x8c   : > { %v300_v9 = vpop.xlane.xlu0 %299 }
  0x8d   : > { %v308_v10 = vmul.f32 %v307_v8, %v300_v9 }
  0x8f   : > { %v309_v11 = vsub.f32 %v849_v0, %v308_v10 }
  0x91   : > { %v310_v12 = vmul.f32 %v309_v11, %v309_v11  ;;  %v337_v45 = vmul.f32 %v626_v40, %v309_v11 }
  0x93   : > { %v311_v13 = vsel %vm297_vm0, %v310_v12, 0.0 }
  0x94   : > { %312 = vadd.xlane.f32.xlu0 %v311_v13 }
 0x107   : > { %v313_v23 = vpop.xlane.xlu0 %312 }
 0x108   : > { %v321_v24 = vmul.f32 %v320_v22, %v313_v23 }
 0x10a   : > { %633 = vrsqrt.f32 %v321_v24  ;;  %vm329_vm3 = vcmp.eq.f32.partialorder %v321_v24, inf  ;;  %v332_v32 = vand.u32 2147483648, %v321_v24  ;;  %vm331_vm4 = vcmp.eq.f32.partialorder %v321_v24, 0.0 }
 0x110   : > { %v634_v25 = vpop.eup %633 }
 0x111   : > { %v323_v26 = vmul.f32 %v634_v25, %v321_v24 }
 0x113   : > { %v324_v27 = vmul.f32 %v634_v25, %v323_v26 }
 0x115   : > { %v325_v28 = vmul.f32 0.5, %v324_v27 }
 0x117   : > { %v326_v29 = vsub.f32 1.5, %v325_v28 }
 0x119   : > { %v327_v30 = vmul.f32 %v634_v25, %v326_v29 }
 0x11b   : > { %v328_v31 = vmul.f32 %v327_v30, %v321_v24 }
 0x11d   : > { %v330_v33 = vsel %vm329_vm3, %v321_v24, %v328_v31 }
 0x11e   : > { %v333_v34 = vsel %vm331_vm4, %v332_v32, %v330_v33 }
 0x11f   : > { %v338_v35 = vadd.f32 1e-06, %v333_v34 }
 0x121   : > { %635 = vrcp.f32 %v338_v35  ;;  %v350_v39 = vand.u32 2147483648, %v338_v35  ;;  %v348_v42 = vand.u32 2147483647, %v338_v35  ;;  %vm344_vm6 = vweird.f32 %v338_v35 }
 0x123   : > { %v351_v44 = vor.u32 1.1754944e-38, %v350_v39  ;;  %vm349_vm8 = vcmp.eq.f32.partialorder %v348_v42, 8.507059e+37 }
 0x127   : > { %v636_v36 = vpop.eup %635 }
 0x128   : > { %v340_v37 = vmul.f32 %v636_v36, %v338_v35  ;;  %vm345_vm5 = vweird.f32 %v636_v36 }
 0x129   : > { %vm346_vm7 = vmor %vm344_vm6, %vm345_vm5 }
 0x12a   : > { %v341_v38 = vsub.f32 1.0, %v340_v37 }
 0x12c   : > { %v342_v41 = vmul.f32 %v636_v36, %v341_v38 }
 0x12e   : > { %v343_v43 = vadd.f32 %v636_v36, %v342_v41 }
 0x130   : > { %v347_v46 = vsel %vm346_vm7, %v636_v36, %v343_v43 }
 0x131   : > { %v352_v48 = vsel %vm349_vm8, %v351_v44, %v347_v46 }
 0x132   : > { %v353_v49 = vmul.f32 %v352_v48, %v337_v45 }
 0x134   : > { %v357_v50 = vadd.f32 %v627_v47, %v353_v49 }
 0x136   : > { %v359_v51 = vpack.c.bf16 %v357_v50, %v357_v50 }
 0x138   : > { %566 = vmatmul.msk.bf16.vlgmr.msra.gmra.mxu0 %vm297_vm0, %v359_v51 }
 0x1b5   : > { %v391_v55 = vpop.f32.mrf.mxu0 }
 0x1b6   : > { %v392_v56 = vadd.f32 %v628_v54, %v391_v55 }
 0x1b8   : > { %v396_v57 = vrot.slane %v392_v56, 6  ;;  %v401_v62 = vrot.slane %v392_v56, 7 }
 0x1ba   : > { %v399_v58 = vsel %vm398_vm9, %v628_v54, %v396_v57  ;;  %v404_v1 = vsel %vm403_vm10, %v358_v63, %v401_v62 }
 0x1bb   : > { %637 = vtanh.f32 %v399_v58 }
 0x1bd   : > { %v393_v59 = vpop.f32.mrf.mxu0 }
 0x1c1   : > { %v638_v60 = vpop.eup %637 }
 0x1c2   : > { %v405_v61 = vpack.c.bf16 %v638_v60, %v638_v60 }
 0x1c4   : > { %575 = vmatmul.msk.bf16.vlgmr.msra.gmra.mxu1 %vm297_vm0, %v405_v61 }
 0x241   : > { %v434_v2 = vpop.f32.mrf.mxu1 }
 0x242   : > { %v438_v3 = vadd.f32 %v434_v2, %v404_v1 }
 0x244   : > { %639 = vtanh.f32 %v438_v3 }
 0x249   : > { %v436_v4 = vpop.f32.mrf.mxu1 }
 0x24a   : > { %v640_v5 = vpop.eup %639 }
 0x24b   : > { %v440_v6 = vpack.c.bf16 %v640_v5, %v640_v5 }
 0x24d   : > { %576 = vmatmul.msk.bf16.vlgmr.msra.gmra.mxu2 %vm297_vm0, %v440_v6 }
 0x2d0   : > { %v453_v7 = vpop.f32.mrf.mxu2 }
 0x2d1   : > { %v457_v8 = vadd.f32 %v453_v7, %v392_v56 }
 0x2d3   : > { %641 = vtanh.f32 %v457_v8 }
 0x2d8   : > { %v455_v9 = vpop.f32.mrf.mxu2 }
 0x2d9   : > { %v642_v10 = vpop.eup %641 }
 0x2da   : > { %v459_v11 = vadd.f32 %v642_v10, %v849_v0 }
 0x2dc   : > { %460 = vst.msk [vmem:[%s292_s8] sm:$0xff] %vm297_vm0, %v459_v11 }
 0x2dd PF: > { %s18_s21 = sadd.s32 1, %s747_s21  }
 0x2de   : > { %p15_p7 = scmp.ge.s32.totalorder %s18_s21, 4  }
 0x2e0   :  { %17 = sbr.rel (!%p15_p7) target bundleno = 2 (0x2), region = 87 }
 0x2e5   :  { %480 = vsyncpa [#allocation3], 1 }
 0x2e6   :  { %482 = vsyncpa [#allocation3 + $0x1], 1 }
 0x2e7   :  { %483 = vsyncpa [#allocation5], 1 }

// kernel: block_forward.5
= control target key start
LH: loop header
LB: loop body
LE: loop exit
PB: predicated region body
PF: predicated region fallthrough
CT: control target
= control target key end

     0   :  { %11 = vsyncpa [#allocation3], 0  ;;  %s793_s0 = inlined_call_operand.vmem [shape: f32[2,8,32], index: 0, kind: input, shape index: {}, may-alias: {0,6}]   ;;  %s794_s1 = inlined_call_operand.vmem [shape: f32[1,32], index: 1, kind: input, shape index: {}]   ;;  %s795_s2 = inlined_call_operand.vmem [shape: f32[1,32], index: 2, kind: input, shape index: {}]   ;;  %s796_s3 = inlined_call_operand.hbm [shape: bf16[32,32], index: 3, kind: input, shape index: {}]   ;;  %s797_s4 = inlined_call_operand.hbm [shape: bf16[32,32], index: 4, kind: input, shape index: {}]   ;;  %s798_s5 = inlined_call_operand.vmem [shape: f32[1,32], index: 5, kind: input, shape index: {}]   ;;  %s799_s6 = inlined_call_operand.vmem [shape: f32[2,8,32], index: 6, kind: output, shape index: {}, may-alias: {0,6}]  }
   0x1   :  { %12 = vsyncpa [#allocation5], 0  ;;  %s727_s21 = smov 0  }
   0x2 LB: > { %s197_s24 = sshll.u32 %s796_s3, 4  ;;  %s524_s25 = sadd.s32 4294967295, %s684_s21   ;;  %s684_s21 = sphi %s727_s21, %s18_s21   ;;  %s198_s24 = int_to_ptr.hbm [resolvable:$true] %s197_s24 }
   0x3   : > { %p526_p0 = scmp.ge.s32.totalorder %s684_s21, 1  ;;  %p180_p1 = scmp.lt.s32.totalorder %s684_s21, 3 }
   0x4   : > { %p575_p2 = scmp.eq.s32.totalorder %s524_s25, 0  ;;  %s686_s27 = smov [#allocation2]  }
   0x5   : > { %p738_p3 = pnand %p526_p0, %p180_p1  ;;  %s199_s28 = sshll.u32 %s686_s27, 4  ;;  %s200_s28 = int_to_ptr.vmem [resolvable:$true] %s199_s28 }
   0x6   : > { %s211_s7 = sshll.u32 %s797_s4, 4  ;;  %s687_s8 = smov [#allocation4]   ;;  %s212_s7 = int_to_ptr.hbm [resolvable:$true] %s211_s7 }
   0x7   : > { %p568_p4 = pneg %p738_p3  ;;  %s213_s9 = sshll.u32 %s687_s8, 4  ;;  %s214_s9 = int_to_ptr.vmem [resolvable:$true] %s213_s9 }
   0x8   : > { %s688_s10 = smov 64   ;;  %s689_s11 = smov 4  }
   0x9   : > { %p569_p5 = pnand %p575_p2, %p568_p4  ;;  %239 = sbr.rel (%p738_p3) target bundleno = 732 (0x2dc), region = 44 }
   0xb   : > { %571 = dma.hbm_to_vmem [thread:$0]  (!%p569_p5), %s198_s24, 256, %s200_s28, [#allocation3], %s688_s10, %s688_s10, %s689_s11  }
   0xc   : > { %574 = dma.hbm_to_vmem [thread:$0]  (!%p569_p5), %s212_s7, 256, %s214_s9, [#allocation5], %s688_s10, %s688_s10, %s689_s11  }
   0xe   : > { %675 = dma.done.wait (%p575_p2), [#allocation3], 256  }
   0xf   : > { %677 = vsyncadd (%p575_p2), [#allocation3], 4294967040 }
  0x10   : > { %679 = dma.done.wait (%p575_p2), [#allocation5], 256  }
  0x11   : > { %681 = vsyncadd (%p575_p2), [#allocation5], 4294967040  ;;  %p273_p6 = scmp.lt.s32.totalorder %s524_s25, 1  ;;  %vm285_vm0 = vcmask 261120   ;;  %v690_v2 = vmov 32.0   ;;  %v691_v14 = vmov 31.0  }
  0x12   : > { %596 = vrcp.f32 %v690_v2  ;;  %v557_v19 = vld [vmem:[#allocation2 + $0x8] sm:$0xff]  ;;  %v556_v20 = vld [vmem:[#allocation2] sm:$0xff]  ;;  %v559_v52 = vld [vmem:[#allocation4 + $0x8] sm:$0xff]  ;;  %vm386_vm9 = vcmask 1041408   ;;  %vm391_vm10 = vcmask 1040384  }
  0x13   : > { %s802_s25 = smov (!%p273_p6, %s524_s25), 1  ;;  %598 = vrcp.f32 %v691_v14  ;;  %376 = vmatpush.bf16.msra.mxu0 %v557_v19  ;;  %v593_v40 = vld [vmem:[%s794_s1] ss:$0 sm:$0xff]  ;;  %419 = vmatpush.bf16.msra.mxu1 %v559_v52  ;;  %v558_v53 = vld [vmem:[#allocation4] sm:$0xff] }
  0x14   : > { %s533_s12 = sshll.u32 %s802_s25, 3  ;;  %v594_v47 = vld [vmem:[%s795_s2] ss:$0 sm:$0xff]  ;;  %438 = vmatpush.bf16.msra.mxu2 %v559_v52 }
  0x15   : > { %s276_s15 = scalar_lea.vmem %s793_s0, %s533_s12  ;;  %v595_v54 = vld [vmem:[%s798_s5] ss:$0 sm:$0xff]  ;;  %s280_s28 = scalar_lea.vmem %s799_s6, %s533_s12 }
  0x16   : > { %v762_v0 = vld [vmem:[%s276_s15] sm:$0xff] }
  0x17   : > { %v286_v1 = vsel %vm285_vm0, %v762_v0, 0.0  ;;  %377 = vmatpush.bf16.msra.mxu0 %v556_v20  ;;  %420 = vmatpush.bf16.msra.mxu1 %v558_v53  ;;  %v346_v63 = vld [vmem:[%s798_s5] sm:$0x1] }
  0x18   : > { %287 = vadd.xlane.f32.xlu0 %v286_v1  ;;  %v597_v3 = vpop.eup %596  ;;  %439 = vmatpush.bf16.msra.mxu2 %v558_v53 }
  0x19   : > { %v290_v4 = vmul.f32 32.0, %v597_v3  ;;  %vm294_vm1 = vweird.f32 %v597_v3  ;;  %v599_v15 = vpop.eup %598 }
  0x1a   : > { %v303_v16 = vmul.f32 31.0, %v599_v15  ;;  %vm307_vm2 = vweird.f32 %v599_v15 }
  0x1b   : > { %v291_v5 = vsub.f32 1.0, %v290_v4 }
  0x1c   : > { %v304_v17 = vsub.f32 1.0, %v303_v16 }
  0x1d   : > { %v292_v6 = vmul.f32 %v597_v3, %v291_v5 }
  0x1e   : > { %v305_v18 = vmul.f32 %v599_v15, %v304_v17 }
  0x1f   : > { %v293_v7 = vadd.f32 %v597_v3, %v292_v6 }
  0x20   : > { %v306_v21 = vadd.f32 %v599_v15, %v305_v18 }
  0x21   : > { %v295_v8 = vsel %vm294_vm1, %v597_v3, %v293_v7 }
  0x22   : > { %v308_v22 = vsel %vm307_vm2, %v599_v15, %v306_v21 }
  0x8b   : > { %v288_v9 = vpop.xlane.xlu0 %287 }
  0x8c   : > { %v296_v10 = vmul.f32 %v295_v8, %v288_v9 }
  0x8e   : > { %v297_v11 = vsub.f32 %v762_v0, %v296_v10 }
  0x90   : > { %v298_v12 = vmul.f32 %v297_v11, %v297_v11  ;;  %v325_v45 = vmul.f32 %v593_v40, %v297_v11 }
  0x92   : > { %v299_v13 = vsel %vm285_vm0, %v298_v12, 0.0 }
  0x93   : > { %300 = vadd.xlane.f32.xlu0 %v299_v13 }
 0x106   : > { %v301_v23 = vpop.xlane.xlu0 %300 }
 0x107   : > { %v309_v24 = vmul.f32 %v308_v22, %v301_v23 }
 0x109   : > { %600 = vrsqrt.f32 %v309_v24  ;;  %vm317_vm3 = vcmp.eq.f32.partialorder %v309_v24, inf  ;;  %v320_v32 = vand.u32 2147483648, %v309_v24  ;;  %vm319_vm4 = vcmp.eq.f32.partialorder %v309_v24, 0.0 }
 0x10f   : > { %v601_v25 = vpop.eup %600 }
 0x110   : > { %v311_v26 = vmul.f32 %v601_v25, %v309_v24 }
 0x112   : > { %v312_v27 = vmul.f32 %v601_v25, %v311_v26 }
 0x114   : > { %v313_v28 = vmul.f32 0.5, %v312_v27 }
 0x116   : > { %v314_v29 = vsub.f32 1.5, %v313_v28 }
 0x118   : > { %v315_v30 = vmul.f32 %v601_v25, %v314_v29 }
 0x11a   : > { %v316_v31 = vmul.f32 %v315_v30, %v309_v24 }
 0x11c   : > { %v318_v33 = vsel %vm317_vm3, %v309_v24, %v316_v31 }
 0x11d   : > { %v321_v34 = vsel %vm319_vm4, %v320_v32, %v318_v33 }
 0x11e   : > { %v326_v35 = vadd.f32 1e-06, %v321_v34 }
 0x120   : > { %602 = vrcp.f32 %v326_v35  ;;  %v338_v39 = vand.u32 2147483648, %v326_v35  ;;  %v336_v42 = vand.u32 2147483647, %v326_v35  ;;  %vm332_vm6 = vweird.f32 %v326_v35 }
 0x122   : > { %v339_v44 = vor.u32 1.1754944e-38, %v338_v39  ;;  %vm337_vm8 = vcmp.eq.f32.partialorder %v336_v42, 8.507059e+37 }
 0x126   : > { %v603_v36 = vpop.eup %602 }
 0x127   : > { %v328_v37 = vmul.f32 %v603_v36, %v326_v35  ;;  %vm333_vm5 = vweird.f32 %v603_v36 }
 0x128   : > { %vm334_vm7 = vmor %vm332_vm6, %vm333_vm5 }
 0x129   : > { %v329_v38 = vsub.f32 1.0, %v328_v37 }
 0x12b   : > { %v330_v41 = vmul.f32 %v603_v36, %v329_v38 }
 0x12d   : > { %v331_v43 = vadd.f32 %v603_v36, %v330_v41 }
 0x12f   : > { %v335_v46 = vsel %vm334_vm7, %v603_v36, %v331_v43 }
 0x130   : > { %v340_v48 = vsel %vm337_vm8, %v339_v44, %v335_v46 }
 0x131   : > { %v341_v49 = vmul.f32 %v340_v48, %v325_v45 }
 0x133   : > { %v345_v50 = vadd.f32 %v594_v47, %v341_v49 }
 0x135   : > { %v347_v51 = vpack.c.bf16 %v345_v50, %v345_v50 }
 0x137   : > { %543 = vmatmul.msk.bf16.vlgmr.msra.gmra.mxu0 %vm285_vm0, %v347_v51 }
 0x1b4   : > { %v379_v55 = vpop.f32.mrf.mxu0 }
 0x1b5   : > { %v380_v56 = vadd.f32 %v595_v54, %v379_v55 }
 0x1b7   : > { %v384_v57 = vrot.slane %v380_v56, 6  ;;  %v389_v62 = vrot.slane %v380_v56, 7 }
 0x1b9   : > { %v387_v58 = vsel %vm386_vm9, %v595_v54, %v384_v57  ;;  %v392_v1 = vsel %vm391_vm10, %v346_v63, %v389_v62 }
 0x1ba   : > { %604 = vtanh.f32 %v387_v58 }
 0x1bc   : > { %v381_v59 = vpop.f32.mrf.mxu0 }
 0x1c0   : > { %v605_v60 = vpop.eup %604 }
 0x1c1   : > { %v393_v61 = vpack.c.bf16 %v605_v60, %v605_v60 }
 0x1c3   : > { %552 = vmatmul.msk.bf16.vlgmr.msra.gmra.mxu1 %vm285_vm0, %v393_v61 }
 0x240   : > { %v422_v2 = vpop.f32.mrf.mxu1 }
 0x241   : > { %v426_v3 = vadd.f32 %v422_v2, %v392_v1 }
 0x243   : > { %606 = vtanh.f32 %v426_v3 }
 0x248   : > { %v424_v4 = vpop.f32.mrf.mxu1 }
 0x249   : > { %v607_v5 = vpop.eup %606 }
 0x24a   : > { %v428_v6 = vpack.c.bf16 %v607_v5, %v607_v5 }
 0x24c   : > { %553 = vmatmul.msk.bf16.vlgmr.msra.gmra.mxu2 %vm285_vm0, %v428_v6 }
 0x2cf   : > { %v441_v7 = vpop.f32.mrf.mxu2 }
 0x2d0   : > { %v445_v8 = vadd.f32 %v441_v7, %v380_v56 }
 0x2d2   : > { %608 = vtanh.f32 %v445_v8 }
 0x2d7   : > { %v443_v9 = vpop.f32.mrf.mxu2 }
 0x2d8   : > { %v609_v10 = vpop.eup %608 }
 0x2d9   : > { %v447_v11 = vadd.f32 %v609_v10, %v762_v0 }
 0x2db   : > { %448 = vst.msk [vmem:[%s280_s28] sm:$0xff] %vm285_vm0, %v447_v11 }
 0x2dc PF: > { %s18_s21 = sadd.s32 1, %s684_s21  }
 0x2dd   : > { %p15_p7 = scmp.ge.s32.totalorder %s18_s21, 4  }
 0x2df   :  { %17 = sbr.rel (!%p15_p7) target bundleno = 2 (0x2), region = 83 }
 0x2e4   :  { %468 = vsyncpa [#allocation3], 1 }
 0x2e5   :  { %470 = vsyncpa [#allocation3 + $0x1], 1 }
 0x2e6   :  { %471 = vsyncpa [#allocation5], 1 }

// kernel: block_forward.6
= control target key start
LH: loop header
LB: loop body
LE: loop exit
PB: predicated region body
PF: predicated region fallthrough
CT: control target
= control target key end

     0   :  { %s1137_s17 = smov 0   ;;  %s1139_s18 = smov 0   ;;  %s1260_s0 = inlined_call_operand.vmem [shape: f32[2,8,32], index: 0, kind: input, shape index: {}, may-alias: {0,11}]   ;;  %s1261_s1 = inlined_call_operand.vmem [shape: f32[1,32], index: 1, kind: input, shape index: {}]   ;;  %s1262_s2 = inlined_call_operand.vmem [shape: f32[1,32], index: 2, kind: input, shape index: {}]   ;;  %s1263_s3 = inlined_call_operand.vmem [shape: bf16[4,32,8], index: 3, kind: input, shape index: {}]   ;;  %s1264_s4 = inlined_call_operand.vmem [shape: f32[4,1,8], index: 4, kind: input, shape index: {}]   ;;  %s1265_s5 = inlined_call_operand.vmem [shape: bf16[4,32,8], index: 5, kind: input, shape index: {}]   ;;  %s1266_s6 = inlined_call_operand.vmem [shape: f32[4,1,8], index: 6, kind: input, shape index: {}]   ;;  %s1267_s7 = inlined_call_operand.vmem [shape: bf16[4,32,8], index: 7, kind: input, shape index: {}]   ;;  %s1268_s8 = inlined_call_operand.vmem [shape: f32[4,1,8], index: 8, kind: input, shape index: {}]   ;;  %s1269_s9 = inlined_call_operand.vmem [shape: bf16[4,8,32], index: 9, kind: input, shape index: {}]   ;;  %s1270_s10 = inlined_call_operand.vmem [shape: f32[1,32], index: 10, kind: input, shape index: {}]   ;;  %s1271_s11 = inlined_call_operand.vmem [shape: f32[2,8,32], index: 11, kind: output, shape index: {}, may-alias: {0,11}]  }
   0x1   :  { %1272 = sst [smem:[#allocation2_spill]] %s1260_s0  ;;  %s1141_s19 = smov 0  }
   0x2   :  { %s1143_s20 = smov 0   ;;  %s1145_s21 = smov 0  }
   0x3 LB: > { %s30_s22 = sadd.s32 1, %s1064_s19  ;;  %s33_s23 = sadd.s32 1, %s1068_s20  ;;  %s1072_s21 = sphi %s1145_s21, %s21_s21   ;;  %s1068_s20 = sphi %s1143_s20, %s1277_s20   ;;  %s1064_s19 = sphi %s1141_s19, %s1276_s19   ;;  %s1060_s18 = sphi %s1139_s18, %s1275_s18   ;;  %s1056_s17 = sphi %s1137_s17, %s1274_s17  }
   0x4   : > { %p31_p0 = scmp.ge.s32.totalorder %s30_s22, 4  ;;  %p921_p1 = scmp.ge.s32.totalorder %s1072_s21, 1 }
   0x5   : > { %p411_p2 = scmp.lt.s32.totalorder %s1072_s21, 9 }
   0x6   : > { %s1279_s22 = smov (%p31_p0, %s30_s22), 0  ;;  %s1281_s23 = smov (!%p31_p0, %s33_s23), %s1068_s20 }
   0x7   : > { %p412_p3 = pnand %p921_p1, %p411_p2  ;;  %p35_p4 = scmp.ge.s32.totalorder %s1281_s23, 2 }
   0x8   : > { %p477_p5 = scmp.lt.s32.totalorder (!%p412_p3), %s1060_s18, 1  ;;  %s1273_s0 = sld [smem:[#allocation2_spill]] (!%p412_p3) }
   0x9   : > { %s1283_s23 = smov (%p35_p4, %s1281_s23), 0  ;;  %415 = sbr.rel (%p412_p3) target bundleno = 1112 (0x458), region = 64 }
   0xa   : > { %p481_p6 = scmp.lt.s32.totalorder (!%p412_p3), %s1056_s17, 3  ;;  %p961_p7 = scmp.ne.s32.totalorder (!%p412_p3), %s1056_s17, 0 }
   0xe   : > { %s1285_s18 = smov (!%p477_p5, %s1060_s18), 1  ;;  %vm517_vm0 = vcmask 261120   ;;  %v1074_v2 = vmov 32.0   ;;  %v1075_v14 = vmov 31.0   ;;  %v1016_v44 = vld [vmem:[%s1261_s1] ss:$0 sm:$0xff] }
   0xf   : > { %s922_s24 = sshll.u32 %s1285_s18, 3  ;;  %1021 = vrcp.f32 %v1074_v2  ;;  %v1017_v51 = vld [vmem:[%s1262_s2] ss:$0 sm:$0xff]  ;;  %vm689_vm9 = vcmask 64512   ;;  %vm727_vm10 = vcmask 1043456  }
  0x10   : > { %s480_s27 = scalar_lea.vmem %s1273_s0, %s922_s24  ;;  %s1175_s30 = scalar_lea.vmem %s1271_s11, %s922_s24  ;;  %1023 = vrcp.f32 %v1075_v14  ;;  %v1076_v14 = vmov -1e+09  }
  0x11   : > { %v1177_v0 = vld [vmem:[%s480_s27] sm:$0xff]  ;;  %s1185_s12 = scalar_select %p481_p6, %s1056_s17, 3 }
  0x12   : > { %v518_v1 = vsel %vm517_vm0, %v1177_v0, 0.0 }
  0x13   : > { %519 = vadd.xlane.f32.xlu0 %v518_v1  ;;  %s488_s15 = scalar_lea.vmem %s1264_s4, %s1185_s12  ;;  %s964_s16 = sshll.u32 %s1185_s12, 4 }
  0x14   : > { %s485_s25 = scalar_lea.vmem %s1263_s3, %s964_s16  ;;  %s493_s28 = scalar_lea.vmem %s1265_s5, %s964_s16  ;;  %v1018_v60 = vld [vmem:[%s488_s15] ss:$0 sm:$0xff] }
  0x15   : > { %v1022_v3 = vpop.eup %1021  ;;  %s501_s13 = scalar_lea.vmem %s1267_s7, %s964_s16  ;;  %v968_v19 = vld [vmem:[%s485_s25 + $0x8] sm:$0xff]  ;;  %v967_v22 = vld [vmem:[%s485_s25] sm:$0xff]  ;;  %s496_s26 = scalar_lea.vmem %s1266_s6, %s1185_s12 }
  0x16   : > { %v522_v4 = vmul.f32 32.0, %v1022_v3  ;;  %vm526_vm1 = vweird.f32 %v1022_v3  ;;  %v1024_v15 = vpop.eup %1023  ;;  %v970_v20 = vld [vmem:[%s493_s28 + $0x8] sm:$0xff]  ;;  %608 = vmatpush.bf16.msra.mxu0 %v968_v19  ;;  %v969_v23 = vld [vmem:[%s493_s28] sm:$0xff]  ;;  %s504_s29 = scalar_lea.vmem %s1268_s8, %s1185_s12  ;;  %s929_s15 = sshll.u32 %s1185_s12, 2 }
  0x17   : > { %v535_v16 = vmul.f32 31.0, %v1024_v15  ;;  %v972_v21 = vld [vmem:[%s501_s13 + $0x8] sm:$0xff]  ;;  %641 = vmatpush.bf16.msra.mxu1 %v970_v20  ;;  %v971_v24 = vld [vmem:[%s501_s13] sm:$0xff]  ;;  %vm539_vm2 = vweird.f32 %v1024_v15  ;;  %s508_s18 = scalar_lea.vmem %s1269_s9, %s929_s15 }
  0x18   : > { %v523_v5 = vsub.f32 1.0, %v522_v4  ;;  %674 = vmatpush.bf16.msra.mxu2 %v972_v21  ;;  %v1019_v56 = vld [vmem:[%s496_s26] ss:$0 sm:$0xff] }
  0x19   : > { %v536_v17 = vsub.f32 1.0, %v535_v16  ;;  %v1020_v62 = vld [vmem:[%s504_s29] ss:$0 sm:$0xff] }
  0x1a   : > { %v524_v6 = vmul.f32 %v1022_v3, %v523_v5  ;;  %609 = vmatpush.bf16.msra.mxu0 %v967_v22 }
  0x1b   : > { %v537_v18 = vmul.f32 %v1024_v15, %v536_v17  ;;  %642 = vmatpush.bf16.msra.mxu1 %v969_v23 }
  0x1c   : > { %v525_v7 = vadd.f32 %v1022_v3, %v524_v6  ;;  %675 = vmatpush.bf16.msra.mxu2 %v971_v24 }
  0x1d   : > { %v538_v25 = vadd.f32 %v1024_v15, %v537_v18 }
  0x1e   : > { %v527_v8 = vsel %vm526_vm1, %v1022_v3, %v525_v7 }
  0x1f   : > { %v540_v26 = vsel %vm539_vm2, %v1024_v15, %v538_v25  ;;  %v745_v25 = vld [vmem:[%s508_s18] sm:$0xf] }
  0x86   : > { %v520_v9 = vpop.xlane.xlu0 %519 }
  0x87   : > { %v528_v10 = vmul.f32 %v527_v8, %v520_v9 }
  0x89   : > { %v529_v11 = vsub.f32 %v1177_v0, %v528_v10  ;;  %v681_v10 = vlaneseq }
  0x8b   : > { %v530_v12 = vmul.f32 %v529_v11, %v529_v11  ;;  %v557_v49 = vmul.f32 %v1016_v44, %v529_v11  ;;  %v682_v11 = vshrl.u32 %v681_v10, 7 }
  0x8d   : > { %v531_v13 = vsel %vm517_vm0, %v530_v12, 0.0  ;;  %v684_v12 = vand.u32 127, %v681_v10 }
  0x8e   : > { %532 = vadd.xlane.f32.xlu0 %v531_v13 }
  0x8f   : > { %vm685_vm11 = vcmp.le.s32.totalorder %v684_v12, %v682_v11 }
  0x90   : > { %v686_v15 = vsel %vm685_vm11, 0.0, %v1076_v14 }
 0x101   : > { %v533_v27 = vpop.xlane.xlu0 %532 }
 0x102   : > { %v541_v28 = vmul.f32 %v540_v26, %v533_v27  ;;  %v750_v26 = vsel %vm727_vm10, %v745_v25, 0 }
 0x103   : > { %759 = vmatpush.bf16.msrb.mxu1 %v750_v26 }
 0x104   : > { %1025 = vrsqrt.f32 %v541_v28  ;;  %vm549_vm3 = vcmp.eq.f32.partialorder %v541_v28, inf  ;;  %v552_v36 = vand.u32 2147483648, %v541_v28  ;;  %vm551_vm4 = vcmp.eq.f32.partialorder %v541_v28, 0.0 }
 0x10a   : > { %v1026_v29 = vpop.eup %1025 }
 0x10b   : > { %v543_v30 = vmul.f32 %v1026_v29, %v541_v28 }
 0x10d   : > { %v544_v31 = vmul.f32 %v1026_v29, %v543_v30 }
 0x10f   : > { %v545_v32 = vmul.f32 0.5, %v544_v31 }
 0x111   : > { %v546_v33 = vsub.f32 1.5, %v545_v32 }
 0x113   : > { %v547_v34 = vmul.f32 %v1026_v29, %v546_v33 }
 0x115   : > { %v548_v35 = vmul.f32 %v547_v34, %v541_v28 }
 0x117   : > { %v550_v37 = vsel %vm549_vm3, %v541_v28, %v548_v35 }
 0x118   : > { %v553_v38 = vsel %vm551_vm4, %v552_v36, %v550_v37 }
 0x119   : > { %v558_v39 = vadd.f32 1e-06, %v553_v38 }
 0x11b   : > { %1027 = vrcp.f32 %v558_v39  ;;  %v570_v43 = vand.u32 2147483648, %v558_v39  ;;  %v568_v46 = vand.u32 2147483647, %v558_v39  ;;  %vm564_vm6 = vweird.f32 %v558_v39 }
 0x11d   : > { %v571_v48 = vor.u32 1.1754944e-38, %v570_v43  ;;  %vm569_vm8 = vcmp.eq.f32.partialorder %v568_v46, 8.507059e+37 }
 0x121   : > { %v1028_v40 = vpop.eup %1027 }
 0x122   : > { %v560_v41 = vmul.f32 %v1028_v40, %v558_v39  ;;  %vm565_vm5 = vweird.f32 %v1028_v40 }
 0x123   : > { %vm566_vm7 = vmor %vm564_vm6, %vm565_vm5 }
 0x124   : > { %v561_v42 = vsub.f32 1.0, %v560_v41 }
 0x126   : > { %v562_v45 = vmul.f32 %v1028_v40, %v561_v42 }
 0x128   : > { %v563_v47 = vadd.f32 %v1028_v40, %v562_v45 }
 0x12a   : > { %v567_v50 = vsel %vm566_vm7, %v1028_v40, %v563_v47 }
 0x12b   : > { %v572_v52 = vsel %vm569_vm8, %v571_v48, %v567_v50 }
 0x12c   : > { %v573_v53 = vmul.f32 %v572_v52, %v557_v49 }
 0x12e   : > { %v577_v54 = vadd.f32 %v1017_v51, %v573_v53 }
 0x130   : > { %v578_v55 = vpack.c.bf16 %v577_v54, %v577_v54 }
 0x132   : > { %939 = vmatmul.msk.bf16.vlgmr.msra.gmra.mxu0 %vm517_vm0, %v578_v55  ;;  %948 = vmatmul.msk.bf16.vlgmr.msra.gmra.mxu1 %vm517_vm0, %v578_v55 }
 0x133   : > { %957 = vmatmul.msk.bf16.vlgmr.msra.gmra.mxu2 %vm517_vm0, %v578_v55 }
 0x1af   : > { %v611_v57 = vpop.f32.mrf.mxu0  ;;  %v644_v58 = vpop.f32.mrf.mxu1 }
 0x1b0   : > { %v645_v59 = vadd.f32 %v1019_v56, %v644_v58  ;;  %v612_v1 = vadd.f32 %v1018_v60, %v611_v57 }
 0x1b2   : > { %v688_v61 = vpack.c.bf16 %v645_v59, %v645_v59  ;;  %v687_v7 = vpack.c.bf16 %v612_v1, %v612_v1 }
 0x1b4   : > { %v694_v63 = vsel %vm689_vm9, %v688_v61, 0 }
 0x1b5   : > { %703 = vmatpush.bf16.xpose.msra.mxu3 %v694_v63 }
 0x1b6   : > { %v677_v2 = vpop.f32.mrf.mxu2 }
 0x1b7   : > { %v678_v3 = vadd.f32 %v1020_v62, %v677_v2  ;;  %v613_v4 = vpop.f32.mrf.mxu0  ;;  %v646_v5 = vpop.f32.mrf.mxu1 }
 0x1b9   : > { %v723_v6 = vpack.c.bf16 %v678_v3, %v678_v3 }
 0x1bb   : > { %v729_v8 = vsel %vm727_vm10, %v723_v6, 0 }
 0x1bc   : > { %738 = vmatpush.bf16.msrb.mxu0 %v729_v8  ;;  %958 = vmatmul.msk.bf16.vlgmr.msra.gmra.mxu3 %vm689_vm9, %v687_v7 }
 0x1be   : > { %v679_v9 = vpop.f32.mrf.mxu2 }
 0x23f   : > { %v705_v13 = vpop.f32.mrf.mxu3 }
 0x240   : > { %v709_v16 = vmul.f32 0.35355338, %v705_v13 }
 0x242   : > { %v710_v17 = vadd.f32 %v709_v16, %v686_v15 }
 0x244   : > { %v711_v18 = vsel %vm689_vm9, %v710_v17, -inf }
 0x245   : > { %712 = vmax.xlane.f32.xlu1 %v711_v18 }
 0x247   : > { %v707_v19 = vpop.f32.mrf.mxu3 }
 0x2b8   : > { %v713_v20 = vpop.xlane.xlu1 %712 }
 0x2b9   : > { %v714_v21 = vsub.f32 %v710_v17, %v713_v20 }
 0x2bb   : > { %v715_v22 = vmul.f32 1.442695, %v714_v21 }
 0x2bd   : > { %1029 = vpow2.f32 %v715_v22 }
 0x2c3   : > { %v1030_v23 = vpop.eup %1029 }
 0x2c4   : > { %v717_v24 = vsel %vm689_vm9, %v1030_v23, 0.0 }
 0x2c5   : > { %718 = vadd.xlane.f32.xlu1 %v717_v24 }
 0x338   : > { %v719_v27 = vpop.xlane.xlu1 %718 }
 0x339   : > { %1031 = vrcp.f32 %v719_v27 }
 0x33f   : > { %v1032_v28 = vpop.eup %1031 }
 0x340   : > { %v721_v29 = vmul.f32 %v1032_v28, %v1030_v23 }
 0x342   : > { %v722_v30 = vpack.c.bf16 %v721_v29, %v721_v29 }
 0x344   : > { %959 = vmatmul.msk.bf16.vlgmr.msrb.gmra.mxu0 %vm689_vm9, %v722_v30 }
 0x3c1   : > { %v740_v31 = vpop.f32.mrf.mxu0 }
 0x3c2   : > { %v744_v32 = vpack.c.bf16 %v740_v31, %v740_v31 }
 0x3c4   : > { %960 = vmatmul.msk.bf16.vlgmr.msrb.gmra.mxu1 %vm689_vm9, %v744_v32 }
 0x3c9   : > { %v742_v33 = vpop.f32.mrf.mxu0 }
 0x441   : > { %v761_v34 = vpop.f32.mrf.mxu1 }
 0x445   : > { %768 = sbr.rel (%p961_p7) target bundleno = 1102 (0x44e), region = 68 }
 0x449   : > { %v763_v35 = vpop.f32.mrf.mxu1 }
 0x44a   : > { %v1033_v36 = vld [vmem:[%s1270_s10] ss:$0 sm:$0xff] }
 0x44b   : > { %v773_v37 = vadd.f32 %v1033_v36, %v1177_v0 }
 0x44d   : > { %774 = vst.msk [vmem:[%s1175_s30] sm:$0xff] %vm517_vm0, %v773_v37 }
 0x44e PF:  {}
 0x454   : > { %v775_v38 = vld [vmem:[%s1175_s30] sm:$0xff] }
 0x455   : > { %v776_v39 = vadd.f32 %v775_v38, %v761_v34 }
 0x457   : > { %777 = vst.msk [vmem:[%s1175_s30] sm:$0xff] %vm517_vm0, %v776_v39 }
 0x458 PF: > { %s21_s21 = sadd.s32 1, %s1072_s21   ;;  %s1274_s17 = smov %s1064_s19 }
 0x459   : > { %p18_p8 = scmp.ge.s32.totalorder %s21_s21, 10   ;;  %s1275_s18 = smov %s1068_s20 }
 0x45a   : > { %s1276_s19 = smov %s1279_s22  ;;  %s1277_s20 = smov %s1283_s23 }
 0x45b   :  { %20 = sbr.rel (!%p18_p8) target bundleno = 3 (0x3), region = 119 }

// kernel: block_forward.7
= control target key start
LH: loop header
LB: loop body
LE: loop exit
PB: predicated region body
PF: predicated region fallthrough
CT: control target
= control target key end

     0   :  { %s646_s24 = smov 0   ;;  %s721_s0 = inlined_call_operand.vmem [shape: f32[16,32], index: 0, kind: input, shape index: {}, may-alias: {0,7}]   ;;  %s722_s1 = inlined_call_operand.vmem [shape: f32[1,32], index: 1, kind: input, shape index: {}]   ;;  %s723_s2 = inlined_call_operand.vmem [shape: f32[1,32], index: 2, kind: input, shape index: {}]   ;;  %s724_s3 = inlined_call_operand.vmem [shape: bf16[32,128], index: 3, kind: input, shape index: {}]   ;;  %s725_s4 = inlined_call_operand.vmem [shape: f32[1,128], index: 4, kind: input, shape index: {}]   ;;  %s726_s5 = inlined_call_operand.vmem [shape: bf16[128,32], index: 5, kind: input, shape index: {}]   ;;  %s727_s6 = inlined_call_operand.vmem [shape: f32[1,32], index: 6, kind: input, shape index: {}]   ;;  %s728_s7 = inlined_call_operand.vmem [shape: f32[16,32], index: 7, kind: output, shape index: {}, may-alias: {0,7}]  }
   0x1 LB: > { %s514_s25 = sadd.s32 4294967295, %s602_s24   ;;  %p518_p0 = scmp.ge.s32.totalorder %s602_s24, 1  ;;  %s602_s24 = sphi %s646_s24, %s17_s24  }
   0x2   : > { %p236_p1 = scmp.lt.s32.totalorder %s602_s24, 3 }
   0x4   : > { %p237_p2 = pnand %p518_p0, %p236_p1 }
   0x5   : > { %p266_p3 = scmp.lt.s32.totalorder (!%p237_p2), %s514_s25, 1 }
   0x6   : > { %240 = sbr.rel (%p237_p2) target bundleno = 569 (0x239), region = 48 }
   0xb   : > { %s730_s25 = smov (!%p266_p3, %s514_s25), 1  ;;  %vm278_vm0 = vcmask 261120   ;;  %v604_v2 = vmov 32.0   ;;  %v605_v14 = vmov 31.0   ;;  %v565_v19 = vld [vmem:[%s724_s3 + $0x8] sm:$0xff]  ;;  %v564_v20 = vld [vmem:[%s724_s3] sm:$0xff] }
   0xc   : > { %s519_s26 = sshll.u32 %s730_s25, 3  ;;  %588 = vrcp.f32 %v604_v2  ;;  %369 = vmatpush.bf16.msra.mxu0 %v565_v19  ;;  %v573_v30 = vld [vmem:[%s726_s5 + $0x38] sm:$0xff]  ;;  %v572_v32 = vld [vmem:[%s726_s5 + $0x30] sm:$0xff]  ;;  %v571_v37 = vld [vmem:[%s726_s5 + $0x28] sm:$0xff] }
   0xd   : > { %s269_s29 = scalar_lea.vmem %s721_s0, %s519_s26  ;;  %590 = vrcp.f32 %v605_v14  ;;  %446 = vmatpush.bf16.msra.mxu1 %v573_v30  ;;  %v570_v39 = vld [vmem:[%s726_s5 + $0x20] sm:$0xff]  ;;  %v569_v40 = vld [vmem:[%s726_s5 + $0x18] sm:$0xff]  ;;  %v568_v44 = vld [vmem:[%s726_s5 + $0x10] sm:$0xff]  ;;  %s273_s17 = scalar_lea.vmem %s728_s7, %s519_s26 }
   0xe   : > { %v662_v0 = vld [vmem:[%s269_s29] sm:$0xff]  ;;  %v567_v58 = vld [vmem:[%s726_s5 + $0x8] sm:$0xff] }
   0xf   : > { %v279_v1 = vsel %vm278_vm0, %v662_v0, 0.0  ;;  %v584_v46 = vld [vmem:[%s722_s1] ss:$0 sm:$0xff] }
  0x10   : > { %280 = vadd.xlane.f32.xlu0 %v279_v1  ;;  %370 = vmatpush.bf16.msra.mxu0 %v564_v20  ;;  %v585_v53 = vld [vmem:[%s723_s2] ss:$0 sm:$0xff] }
  0x11   : > { %447 = vmatpush.bf16.msra.mxu1 %v572_v32  ;;  %v566_v59 = vld [vmem:[%s726_s5] sm:$0xff] }
  0x12   : > { %v589_v3 = vpop.eup %588  ;;  %v586_v60 = vld [vmem:[%s725_s4] ss:$0 sm:$0xff] }
  0x13   : > { %v283_v4 = vmul.f32 32.0, %v589_v3  ;;  %vm287_vm1 = vweird.f32 %v589_v3  ;;  %v591_v15 = vpop.eup %590 }
  0x14   : > { %v296_v16 = vmul.f32 31.0, %v591_v15  ;;  %vm300_vm2 = vweird.f32 %v591_v15 }
  0x15   : > { %v284_v5 = vsub.f32 1.0, %v283_v4  ;;  %448 = vmatpush.bf16.msra.mxu1 %v571_v37 }
  0x16   : > { %v297_v17 = vsub.f32 1.0, %v296_v16 }
  0x17   : > { %v285_v6 = vmul.f32 %v589_v3, %v284_v5 }
  0x18   : > { %v298_v18 = vmul.f32 %v591_v15, %v297_v17 }
  0x19   : > { %v286_v7 = vadd.f32 %v589_v3, %v285_v6  ;;  %449 = vmatpush.bf16.msra.mxu1 %v570_v39 }
  0x1a   : > { %v299_v21 = vadd.f32 %v591_v15, %v298_v18 }
  0x1b   : > { %v288_v8 = vsel %vm287_vm1, %v589_v3, %v286_v7  ;;  %v587_v3 = vld [vmem:[%s727_s6] ss:$0 sm:$0xff] }
  0x1c   : > { %v301_v22 = vsel %vm300_vm2, %v591_v15, %v299_v21 }
  0x1d   : > { %450 = vmatpush.bf16.msra.mxu1 %v569_v40 }
  0x21   : > { %451 = vmatpush.bf16.msra.mxu1 %v568_v44 }
  0x25   : > { %452 = vmatpush.bf16.msra.mxu1 %v567_v58 }
  0x29   : > { %453 = vmatpush.bf16.msra.mxu1 %v566_v59 }
  0x83   : > { %v281_v9 = vpop.xlane.xlu0 %280 }
  0x84   : > { %v289_v10 = vmul.f32 %v288_v8, %v281_v9 }
  0x86   : > { %v290_v11 = vsub.f32 %v662_v0, %v289_v10 }
  0x88   : > { %v291_v12 = vmul.f32 %v290_v11, %v290_v11  ;;  %v318_v51 = vmul.f32 %v584_v46, %v290_v11 }
  0x8a   : > { %v292_v13 = vsel %vm278_vm0, %v291_v12, 0.0 }
  0x8b   : > { %293 = vadd.xlane.f32.xlu0 %v292_v13 }
  0xfe   : > { %v294_v23 = vpop.xlane.xlu0 %293 }
  0xff   : > { %v302_v24 = vmul.f32 %v301_v22, %v294_v23 }
 0x101   : > { %592 = vrsqrt.f32 %v302_v24  ;;  %vm310_vm3 = vcmp.eq.f32.partialorder %v302_v24, inf  ;;  %v313_v34 = vand.u32 2147483648, %v302_v24  ;;  %vm312_vm4 = vcmp.eq.f32.partialorder %v302_v24, 0.0 }
 0x107   : > { %v593_v25 = vpop.eup %592 }
 0x108   : > { %v304_v26 = vmul.f32 %v593_v25, %v302_v24 }
 0x10a   : > { %v305_v27 = vmul.f32 %v593_v25, %v304_v26 }
 0x10c   : > { %v306_v28 = vmul.f32 0.5, %v305_v27 }
 0x10e   : > { %v307_v29 = vsub.f32 1.5, %v306_v28 }
 0x110   : > { %v308_v31 = vmul.f32 %v593_v25, %v307_v29 }
 0x112   : > { %v309_v33 = vmul.f32 %v308_v31, %v302_v24 }
 0x114   : > { %v311_v35 = vsel %vm310_vm3, %v302_v24, %v309_v33 }
 0x115   : > { %v314_v36 = vsel %vm312_vm4, %v313_v34, %v311_v35 }
 0x116   : > { %v319_v38 = vadd.f32 1e-06, %v314_v36 }
 0x118   : > { %594 = vrcp.f32 %v319_v38  ;;  %v331_v45 = vand.u32 2147483648, %v319_v38  ;;  %v329_v48 = vand.u32 2147483647, %v319_v38  ;;  %vm325_vm6 = vweird.f32 %v319_v38 }
 0x11a   : > { %v332_v50 = vor.u32 1.1754944e-38, %v331_v45  ;;  %vm330_vm8 = vcmp.eq.f32.partialorder %v329_v48, 8.507059e+37 }
 0x11e   : > { %v595_v41 = vpop.eup %594 }
 0x11f   : > { %v321_v42 = vmul.f32 %v595_v41, %v319_v38  ;;  %vm326_vm5 = vweird.f32 %v595_v41 }
 0x120   : > { %vm327_vm7 = vmor %vm325_vm6, %vm326_vm5 }
 0x121   : > { %v322_v43 = vsub.f32 1.0, %v321_v42 }
 0x123   : > { %v323_v47 = vmul.f32 %v595_v41, %v322_v43 }
 0x125   : > { %v324_v49 = vadd.f32 %v595_v41, %v323_v47 }
 0x127   : > { %v328_v52 = vsel %vm327_vm7, %v595_v41, %v324_v49 }
 0x128   : > { %v333_v54 = vsel %vm330_vm8, %v332_v50, %v328_v52 }
 0x129   : > { %v334_v55 = vmul.f32 %v333_v54, %v318_v51 }
 0x12b   : > { %v338_v56 = vadd.f32 %v585_v53, %v334_v55 }
 0x12d   : > { %v339_v57 = vpack.c.bf16 %v338_v56, %v338_v56 }
 0x12f   : > { %529 = vmatmul.msk.bf16.vlgmr.msra.gmra.mxu0 %vm278_vm0, %v339_v57 }
 0x1ac   : > { %v372_v61 = vpop.f32.mrf.mxu0 }
 0x1ad   : > { %v373_v62 = vadd.f32 %v586_v60, %v372_v61 }
 0x1af   : > { %v376_v63 = vmax.f32 %v373_v62, 0.0 }
 0x1b1   : > { %v377_v1 = vpack.c.bf16 %v376_v63, %v376_v63 }
 0x1b3   : > { %454 = vmatmul.bf16.vlgmr.msra.gmra.mxu1 %v377_v1 }
 0x1b4   : > { %v374_v2 = vpop.f32.mrf.mxu0 }
 0x230   : > { %v455_v4 = vpop.f32.mrf.mxu1 }
 0x231   : > { %v456_v5 = vadd.f32 %v587_v3, %v455_v4 }
 0x233   : > { %v459_v6 = vadd.f32 %v456_v5, %v662_v0 }
 0x235   : > { %460 = vst.msk [vmem:[%s273_s17] sm:$0xff] %vm278_vm0, %v459_v6 }
 0x238   : > { %v457_v7 = vpop.f32.mrf.mxu1 }
 0x239 PF: > { %s17_s24 = sadd.s32 1, %s602_s24  }
 0x23a   : > { %p14_p4 = scmp.ge.s32.totalorder %s17_s24, 4  }
 0x23c   :  { %16 = sbr.rel (!%p14_p4) target bundleno = 1 (0x1), region = 78 }

</bundles_post_ra>
